<compile_context>
chip_gen: v7x
topology: tpu7x:2x2x1
jax: 0.10.0
libtpu: 0.0.40
codegen_flags: <defaults>
</compile_context>

<pallas_src>
import jax
import jax.numpy as jnp
from jax.experimental import pallas as pl
from jax.experimental.pallas import tpu as pltpu

FC1_DIMS = 1024
FC2_DIMS = 512
LOG_STD_MIN = -20.0
LOG_STD_MAX = 2.0

LANE = 128
SUBLANE = 8


def _round_up(x, m):
    return (x + m - 1) // m * m


def actor_mu_kernel(x_ref, w1_ref, b1_ref, w2_ref, b2_ref, w3_ref, b3_ref,
                    mu_ref):
    # Weights may be f32 or bf16; activations are cast to the weight dtype so
    # the MXU runs a homogeneous-dtype matmul with f32 accumulation.
    cdt = w1_ref.dtype
    x = x_ref[...].astype(cdt)                                   # (TB, D_in)

    # fc1 + relu
    h1 = jnp.dot(x, w1_ref[...], preferred_element_type=jnp.float32)
    h1 = jnp.maximum(h1 + b1_ref[...], 0.0)                      # (TB, FC1) f32

    # fc2 + relu
    h2 = jnp.dot(h1.astype(cdt), w2_ref[...],
                 preferred_element_type=jnp.float32)
    h2 = jnp.maximum(h2 + b2_ref[...], 0.0)                      # (TB, FC2) f32

    # fc3 + tanh -> mu  (A padded to a full 128-lane slab; padded cols are 0)
    h3 = jnp.dot(h2.astype(cdt), w3_ref[...],
                 preferred_element_type=jnp.float32)
    mu_ref[...] = jnp.tanh(h3 + b3_ref[...])                     # (TB, A_pad)


def actor_forward(x, params, *, tile_b=256, compute_dtype=jnp.float32):
    """Returns (mu, std) of the policy Normal distribution.

    tile_b:        batch tile (128 recommended on v5e, 256-512 on v6e/v7x);
                   capped at the (8-rounded) batch for small inputs.
    compute_dtype: dtype of the weights fed to the MXU (f32 or bf16);
                   accumulation and all elementwise math stay f32.
    """
    w1, b1, w2, b2, w3, b3, log_std = params
    B, d_in = x.shape
    A = w3.shape[1]

    # --- lane-dense output: pad the action dim to a full 128-lane slab -------
    A_pad = _round_up(A, LANE)
    if A_pad != A:
        w3p = jnp.zeros((FC2_DIMS, A_pad), w3.dtype).at[:, :A].set(w3)
        b3p = jnp.zeros((1, A_pad), b3.dtype).at[:, :A].set(b3)
    else:
        w3p, b3p = w3, b3

    # Weights to the MXU compute dtype (biases stay f32 for the f32 adds).
    w1c = w1.astype(compute_dtype)
    w2c = w2.astype(compute_dtype)
    w3c = w3p.astype(compute_dtype)
    b1f = b1.astype(jnp.float32)
    b2f = b2.astype(jnp.float32)
    b3f = b3p.astype(jnp.float32)

    # --- batch padding (round-up instead of an assert) ------------------------
    tb = min(tile_b, _round_up(B, SUBLANE))      # don't over-tile tiny batches
    B_pad = _round_up(B, tb)
    xp = x if B_pad == B else jnp.zeros((B_pad, d_in), x.dtype).at[:B].set(x)

    grid = (B_pad // tb,)
    full = lambda a: pl.BlockSpec(a.shape, lambda i: (0, 0))  # weight-resident

    # Advisory cost estimate for the XLA scheduler.
    flops = 2 * B_pad * (d_in * FC1_DIMS + FC1_DIMS * FC2_DIMS + FC2_DIMS * A_pad)
    bytes_accessed = (
        xp.size * xp.dtype.itemsize
        + sum(a.size * a.dtype.itemsize for a in (w1c, b1f, w2c, b2f, w3c, b3f))
        + B_pad * A_pad * 4)
    cost = pl.CostEstimate(flops=flops, transcendentals=B_pad * A_pad,
                           bytes_accessed=bytes_accessed)

    mu_pad = pl.pallas_call(
        actor_mu_kernel,
        out_shape=jax.ShapeDtypeStruct((B_pad, A_pad), jnp.float32),
        grid_spec=pltpu.PrefetchScalarGridSpec(
            num_scalar_prefetch=0,
            grid=grid,
            in_specs=[
                pl.BlockSpec((tb, d_in), lambda i: (i, 0)),   # x tile
                full(w1c), full(b1f),
                full(w2c), full(b2f),
                full(w3c), full(b3f),
            ],
            out_specs=pl.BlockSpec((tb, A_pad), lambda i: (i, 0)),
        ),
        compiler_params=pltpu.CompilerParams(
            dimension_semantics=("parallel",),
            vmem_limit_bytes=64 * 1024 * 1024),
        cost_estimate=cost,
    )(xp, w1c, b1f, w2c, b2f, w3c, b3f)

    mu = mu_pad[:B, :A]

    # std = exp(clamp(log_std)).expand_as(mu): independent of x, so computed
    # once outside the kernel (no per-tile recompute / writeback).
    std = jnp.broadcast_to(
        jnp.exp(jnp.clip(log_std, LOG_STD_MIN, LOG_STD_MAX)), mu.shape)
    return mu, std


def init_params(key, input_dim, action_space):
    """Deterministic parameter init (shapes match the PyTorch module)."""
    ks = jax.random.split(key, 6)
    s1 = 1.0 / jnp.sqrt(jnp.float32(input_dim))
    s2 = 1.0 / jnp.sqrt(jnp.float32(FC1_DIMS))
    s3 = 1.0 / jnp.sqrt(jnp.float32(FC2_DIMS))
    w1 = jax.random.uniform(ks[0], (input_dim, FC1_DIMS), jnp.float32, -s1, s1)
    b1 = jax.random.uniform(ks[1], (1, FC1_DIMS), jnp.float32, -s1, s1)
    w2 = jax.random.uniform(ks[2], (FC1_DIMS, FC2_DIMS), jnp.float32, -s2, s2)
    b2 = jax.random.uniform(ks[3], (1, FC2_DIMS), jnp.float32, -s2, s2)
    w3 = jax.random.uniform(ks[4], (FC2_DIMS, action_space), jnp.float32, -s3, s3)
    b3 = jax.random.uniform(ks[5], (1, action_space), jnp.float32, -s3, s3)
    log_std = jnp.ones((1, action_space), jnp.float32) * 0.01
    return (w1, b1, w2, b2, w3, b3, log_std)


def reference_forward(x, params):
    w1, b1, w2, b2, w3, b3, log_std = params
    h1 = jnp.maximum(x @ w1 + b1, 0.0)
    h2 = jnp.maximum(h1 @ w2 + b2, 0.0)
    mu = jnp.tanh(h2 @ w3 + b3)
    std = jnp.broadcast_to(jnp.exp(jnp.clip(log_std, LOG_STD_MIN, LOG_STD_MAX)),
                           mu.shape)
    return mu, std


if __name__ == "__main__":
    key = jax.random.PRNGKey(0)
    k_x, k_p, k_x2 = jax.random.split(key, 3)

    batch = 8           # small demo batch
    input_dim = 16      # observation dim (input_shape[0])
    action_space = 4

    x = jax.random.normal(k_x, (batch, input_dim), jnp.float32)
    params = init_params(k_p, input_dim, action_space)

    # f32 path (default)
    mu, std = actor_forward(x, params)
    jax.block_until_ready((mu, std))
    mu_ref, std_ref = reference_forward(x, params)
    assert mu.shape == (batch, action_space)
    assert jnp.allclose(mu, mu_ref, atol=1e-5, rtol=1e-5)
    assert jnp.allclose(std, std_ref, atol=1e-6, rtol=1e-6)

    # non-multiple batch exercises the round-up/padding path
    x_odd = jax.random.normal(k_x2, (50, input_dim), jnp.float32)
    mu_o, std_o = actor_forward(x_odd, params)
    jax.block_until_ready((mu_o, std_o))
    mu_o_ref, std_o_ref = reference_forward(x_odd, params)
    assert mu_o.shape == (50, action_space)
    assert jnp.allclose(mu_o, mu_o_ref, atol=1e-5, rtol=1e-5)
    assert jnp.allclose(std_o, std_o_ref, atol=1e-6, rtol=1e-6)

    # bf16-weight fast path (v6e/v7x MXU); loose tolerance vs f32 reference
    mu_bf, _ = actor_forward(x, params, compute_dtype=jnp.bfloat16)
    jax.block_until_ready(mu_bf)
    assert jnp.allclose(mu_bf, mu_ref, atol=5e-2, rtol=5e-2)

    # TODO(synk): sampling / log_prob of torch.distributions.Normal is left to
    # the caller; the kernel returns the distribution parameters (mu, std).
    print("KERNEL_OK")
</pallas_src>

<mosaic_0001>
module attributes {stable_mosaic.version = 11 : i64} {
  func.func @actor_mu_kernel(%arg0: i32, %arg1: memref<8x16xf32, #tpu.memory_space<vmem>>, %arg2: memref<16x1024xf32, #tpu.memory_space<vmem>>, %arg3: memref<1x1024xf32, #tpu.memory_space<vmem>>, %arg4: memref<1024x512xf32, #tpu.memory_space<vmem>>, %arg5: memref<1x512xf32, #tpu.memory_space<vmem>>, %arg6: memref<512x128xf32, #tpu.memory_space<vmem>>, %arg7: memref<1x128xf32, #tpu.memory_space<vmem>>, %arg8: memref<8x128xf32, #tpu.memory_space<vmem>>) attributes {dimension_semantics = [#tpu.dimension_semantics<parallel>], iteration_bounds = array<i64: 1>, scalar_prefetch = 0 : i64, scratch_operands = 0 : i64, tpu.core_type = #tpu.core_type<tc>, window_params = [{transform_indices = @transform_0, window_bounds = array<i64: 8, 16>}, {pipeline_mode = #tpu.pipeline_mode<synchronous>, transform_indices = @transform_1, window_bounds = array<i64: 16, 1024>}, {pipeline_mode = #tpu.pipeline_mode<synchronous>, transform_indices = @transform_2, window_bounds = array<i64: 1, 1024>}, {pipeline_mode = #tpu.pipeline_mode<synchronous>, transform_indices = @transform_3, window_bounds = array<i64: 1024, 512>}, {pipeline_mode = #tpu.pipeline_mode<synchronous>, transform_indices = @transform_4, window_bounds = array<i64: 1, 512>}, {pipeline_mode = #tpu.pipeline_mode<synchronous>, transform_indices = @transform_5, window_bounds = array<i64: 512, 128>}, {pipeline_mode = #tpu.pipeline_mode<synchronous>, transform_indices = @transform_6, window_bounds = array<i64: 1, 128>}, {transform_indices = @transform_7, window_bounds = array<i64: 8, 128>}]} {
    %c0 = arith.constant 0 : index
    %c0_0 = arith.constant 0 : index
    %0 = vector.load %arg1[%c0, %c0_0] : memref<8x16xf32, #tpu.memory_space<vmem>>, vector<8x16xf32>
    %c0_1 = arith.constant 0 : index
    %c0_2 = arith.constant 0 : index
    %1 = vector.load %arg2[%c0_1, %c0_2] : memref<16x1024xf32, #tpu.memory_space<vmem>>, vector<16x1024xf32>
    %cst = arith.constant dense<0.000000e+00> : vector<8x1024xf32>
    %2 = tpu.matmul %0, %1, %cst {dimension_numbers = #tpu.dot_dimension_numbers<[1], [0], [0], [1], [0, 0, 1, 1], [], []>} : vector<8x16xf32>, vector<16x1024xf32>, vector<8x1024xf32> -> vector<8x1024xf32>
    %c0_3 = arith.constant 0 : index
    %c0_4 = arith.constant 0 : index
    %3 = vector.load %arg3[%c0_3, %c0_4] : memref<1x1024xf32, #tpu.memory_space<vmem>>, vector<1x1024xf32>
    %4 = vector.broadcast %3 : vector<1x1024xf32> to vector<8x1024xf32>
    %5 = arith.addf %2, %4 : vector<8x1024xf32>
    %cst_5 = arith.constant 0.000000e+00 : f32
    %6 = vector.broadcast %cst_5 : f32 to vector<8x1024xf32>
    %7 = arith.maximumf %5, %6 : vector<8x1024xf32>
    %c0_6 = arith.constant 0 : index
    %c0_7 = arith.constant 0 : index
    %8 = vector.load %arg4[%c0_6, %c0_7] : memref<1024x512xf32, #tpu.memory_space<vmem>>, vector<1024x512xf32>
    %cst_8 = arith.constant dense<0.000000e+00> : vector<8x512xf32>
    %9 = tpu.matmul %7, %8, %cst_8 {dimension_numbers = #tpu.dot_dimension_numbers<[1], [0], [0], [1], [0, 0, 1, 1], [], []>} : vector<8x1024xf32>, vector<1024x512xf32>, vector<8x512xf32> -> vector<8x512xf32>
    %c0_9 = arith.constant 0 : index
    %c0_10 = arith.constant 0 : index
    %10 = vector.load %arg5[%c0_9, %c0_10] : memref<1x512xf32, #tpu.memory_space<vmem>>, vector<1x512xf32>
    %11 = vector.broadcast %10 : vector<1x512xf32> to vector<8x512xf32>
    %12 = arith.addf %9, %11 : vector<8x512xf32>
    %cst_11 = arith.constant 0.000000e+00 : f32
    %13 = vector.broadcast %cst_11 : f32 to vector<8x512xf32>
    %14 = arith.maximumf %12, %13 : vector<8x512xf32>
    %c0_12 = arith.constant 0 : index
    %c0_13 = arith.constant 0 : index
    %15 = vector.load %arg6[%c0_12, %c0_13] : memref<512x128xf32, #tpu.memory_space<vmem>>, vector<512x128xf32>
    %cst_14 = arith.constant dense<0.000000e+00> : vector<8x128xf32>
    %16 = tpu.matmul %14, %15, %cst_14 {dimension_numbers = #tpu.dot_dimension_numbers<[1], [0], [0], [1], [0, 0, 1, 1], [], []>} : vector<8x512xf32>, vector<512x128xf32>, vector<8x128xf32> -> vector<8x128xf32>
    %c0_15 = arith.constant 0 : index
    %c0_16 = arith.constant 0 : index
    %17 = vector.load %arg7[%c0_15, %c0_16] : memref<1x128xf32, #tpu.memory_space<vmem>>, vector<1x128xf32>
    %18 = vector.broadcast %17 : vector<1x128xf32> to vector<8x128xf32>
    %19 = arith.addf %16, %18 : vector<8x128xf32>
    %20 = math.tanh %19 : vector<8x128xf32>
    %c0_17 = arith.constant 0 : index
    %c0_18 = arith.constant 0 : index
    %21 = vector.load %arg8[%c0_17, %c0_18] : memref<8x128xf32, #tpu.memory_space<vmem>>, vector<8x128xf32>
    tpu.vector_store %arg8[%c0_17, %c0_18], %20 {strides = array<i32>} : memref<8x128xf32, #tpu.memory_space<vmem>>, vector<8x128xf32>,
    return
  }
  func.func @transform_0(%arg0: i32) -> (i32, i32) {
    %c0_i32 = arith.constant 0 : i32
    %c0_i32_0 = arith.constant 0 : i32
    return %arg0, %c0_i32 : i32, i32
  }
  func.func @transform_1(%arg0: i32) -> (i32, i32) {
    %c0_i32 = arith.constant 0 : i32
    %c0_i32_0 = arith.constant 0 : i32
    %c0_i32_1 = arith.constant 0 : i32
    return %c0_i32, %c0_i32_0 : i32, i32
  }
  func.func @transform_2(%arg0: i32) -> (i32, i32) {
    %c0_i32 = arith.constant 0 : i32
    %c0_i32_0 = arith.constant 0 : i32
    %c0_i32_1 = arith.constant 0 : i32
    return %c0_i32, %c0_i32_0 : i32, i32
  }
  func.func @transform_3(%arg0: i32) -> (i32, i32) {
    %c0_i32 = arith.constant 0 : i32
    %c0_i32_0 = arith.constant 0 : i32
    %c0_i32_1 = arith.constant 0 : i32
    return %c0_i32, %c0_i32_0 : i32, i32
  }
  func.func @transform_4(%arg0: i32) -> (i32, i32) {
    %c0_i32 = arith.constant 0 : i32
    %c0_i32_0 = arith.constant 0 : i32
    %c0_i32_1 = arith.constant 0 : i32
    return %c0_i32, %c0_i32_0 : i32, i32
  }
  func.func @transform_5(%arg0: i32) -> (i32, i32) {
    %c0_i32 = arith.constant 0 : i32
    %c0_i32_0 = arith.constant 0 : i32
    %c0_i32_1 = arith.constant 0 : i32
    return %c0_i32, %c0_i32_0 : i32, i32
  }
  func.func @transform_6(%arg0: i32) -> (i32, i32) {
    %c0_i32 = arith.constant 0 : i32
    %c0_i32_0 = arith.constant 0 : i32
    %c0_i32_1 = arith.constant 0 : i32
    return %c0_i32, %c0_i32_0 : i32, i32
  }
  func.func @transform_7(%arg0: i32) -> (i32, i32) {
    %c0_i32 = arith.constant 0 : i32
    %c0_i32_0 = arith.constant 0 : i32
    return %arg0, %c0_i32 : i32, i32
  }
}

</mosaic_0001>

<bundles_post_ra>
// kernel: tpu_custom_call.1
= control target key start
LH: loop header
LB: loop body
LE: loop exit
PB: predicated region body
PF: predicated region fallthrough
CT: control target
= control target key end

     0   :  { %12 = vsyncpa [#allocation3], 0  ;;  %s2901_s0 = inlined_call_operand.hbm [shape: f32[8,16], index: 0, kind: input, shape index: {}]   ;;  %s2902_s1 = inlined_call_operand.hbm [shape: f32[16,1024], index: 1, kind: input, shape index: {}]   ;;  %s2903_s2 = inlined_call_operand.hbm [shape: f32[1,1024], index: 2, kind: input, shape index: {}]   ;;  %s2904_s3 = inlined_call_operand.hbm [shape: f32[1024,512], index: 3, kind: input, shape index: {}]   ;;  %s2905_s4 = inlined_call_operand.hbm [shape: f32[1,512], index: 4, kind: input, shape index: {}]   ;;  %s2906_s5 = inlined_call_operand.hbm [shape: f32[512,128], index: 5, kind: input, shape index: {}]   ;;  %s2907_s6 = inlined_call_operand.hbm [shape: f32[1,128], index: 6, kind: input, shape index: {}]   ;;  %s2908_s7 = inlined_call_operand.hbm [shape: f32[8,128], index: 7, kind: output, shape index: {}]  }
   0x1   :  { %13 = vsyncpa [#allocation6], 0 }
   0x2   :  { %14 = vsyncpa [#allocation9], 0 }
   0x3   :  { %15 = vsyncpa [#allocation12], 0 }
   0x4   :  { %16 = vsyncpa [#allocation4], 0  ;;  %s2693_s24 = smov [#allocation5]   ;;  %s2507_s28 = scalar_lea.hbm %s2902_s1, 2048 }
   0x5   :  { %s32_s25 = sshll.u32 %s2693_s24, 4  ;;  %p2508_p0 = scmp.ne.s32.totalorder %s2902_s1, %s2507_s28  ;;  %s33_s25 = int_to_ptr.vmem [resolvable:$true] %s32_s25 }
   0x6   :  { %p2511_p1 = scmp.lt.u32.totalorder %s2507_s28, %s2902_s1 }
   0x8   :  { %p2513_p2 = pnand %p2511_p1, %p2508_p0 }
   0xa   :  { %2516 = shalt.err (!%p2513_p2)
}
   0xb   :  { %s2517_s10 = scalar_lea.vmem %s33_s25, 2048  ;;  %p2522_p4 = scmp.lt.s32.totalorder %s33_s25, %s33_s25 }
   0xc   :  { %p2518_p3 = scmp.ne.s32.totalorder %s33_s25, %s2517_s10  ;;  %p2523_p5 = scmp.lt.s32.totalorder %s2517_s10, %s2517_s10 }
   0xe   :  { %p2524_p6 = por %p2523_p5, %p2522_p4 }
  0x10   :  { %p2525_p7 = pnand %p2524_p6, %p2518_p3 }
  0x12   :  { %2528 = shalt.err (!%p2525_p7)
}
  0x13   :  { %s2694_s11 = smov 1024   ;;  %s2695_s12 = smov 64  }
  0x14   :  { %38 = dma.hbm_to_vmem [thread:$0]  %s2902_s1, 2048, %s33_s25, [#allocation6], %s2694_s11, %s2694_s11, %s2695_s12  }
  0x15   :  { %s2696_s15 = smov [#allocation8]   ;;  %s2529_s19 = scalar_lea.hbm %s2904_s3, 65536 }
  0x16   :  { %s54_s16 = sshll.u32 %s2696_s15, 4  ;;  %p2530_p8 = scmp.ne.s32.totalorder %s2904_s3, %s2529_s19  ;;  %s55_s16 = int_to_ptr.vmem [resolvable:$true] %s54_s16 }
  0x17   :  { %p2533_p9 = scmp.lt.u32.totalorder %s2529_s19, %s2904_s3 }
  0x19   :  { %p2535_p10 = pnand %p2533_p9, %p2530_p8 }
  0x1b   :  { %2538 = shalt.err (!%p2535_p10)
}
  0x1c   :  { %s2539_s24 = scalar_lea.vmem %s55_s16, 65536  ;;  %p2544_p12 = scmp.lt.s32.totalorder %s55_s16, %s55_s16 }
  0x1d   :  { %p2540_p11 = scmp.ne.s32.totalorder %s55_s16, %s2539_s24  ;;  %p2545_p13 = scmp.lt.s32.totalorder %s2539_s24, %s2539_s24 }
  0x1f   :  { %p2546_p0 = por %p2545_p13, %p2544_p12 }
  0x21   :  { %p2547_p1 = pnand %p2546_p0, %p2540_p11 }
  0x23   :  { %2550 = shalt.err (!%p2547_p1)
}
  0x24   :  { %s2697_s1 = smov 512   ;;  %s2698_s25 = smov 32  }
  0x25   :  { %60 = dma.hbm_to_vmem [thread:$0]  %s2904_s3, 65536, %s55_s16, [#allocation9], %s2697_s1, %s2697_s1, %s2698_s25  }
  0x26   :  { %s2699_s28 = smov [#allocation11]   ;;  %s2551_s9 = scalar_lea.hbm %s2906_s5, 8192 }
  0x27   :  { %s76_s29 = sshll.u32 %s2699_s28, 4  ;;  %p2552_p2 = scmp.ne.s32.totalorder %s2906_s5, %s2551_s9  ;;  %s77_s29 = int_to_ptr.vmem [resolvable:$true] %s76_s29 }
  0x28   :  { %p2555_p3 = scmp.lt.u32.totalorder %s2551_s9, %s2906_s5 }
  0x2a   :  { %p2557_p4 = pnand %p2555_p3, %p2552_p2 }
  0x2c   :  { %2560 = shalt.err (!%p2557_p4)
}
  0x2d   :  { %s2561_s14 = scalar_lea.vmem %s77_s29, 8192  ;;  %p2566_p6 = scmp.lt.s32.totalorder %s77_s29, %s77_s29 }
  0x2e   :  { %p2562_p5 = scmp.ne.s32.totalorder %s77_s29, %s2561_s14  ;;  %p2567_p7 = scmp.lt.s32.totalorder %s2561_s14, %s2561_s14 }
  0x30   :  { %p2568_p8 = por %p2567_p7, %p2566_p6 }
  0x32   :  { %p2569_p9 = pnand %p2568_p8, %p2562_p5 }
  0x34   :  { %2572 = shalt.err (!%p2569_p9)
}
  0x35   :  { %s2700_s3 = smov 128   ;;  %s2701_s15 = smov 8  }
  0x36   :  { %82 = dma.hbm_to_vmem [thread:$0]  %s2906_s5, 8192, %s77_s29, [#allocation12], %s2700_s3, %s2700_s3, %s2701_s15  }
  0x37   :  { %s2702_s18 = smov [#allocation2]   ;;  %s2703_s20 = smov [#allocation7]  }
  0x38   :  { %s23_s19 = sshll.u32 %s2702_s18, 4  ;;  %s45_s21 = sshll.u32 %s2703_s20, 4  ;;  %s24_s19 = int_to_ptr.vmem [resolvable:$true] %s23_s19  ;;  %s46_s21 = int_to_ptr.vmem [resolvable:$true] %s45_s21 }
  0x39   :  { %s2573_s24 = scalar_lea.hbm %s2901_s0, 128 }
  0x3a   :  { %p2574_p10 = scmp.ne.s32.totalorder %s2901_s0, %s2573_s24  ;;  %p2577_p11 = scmp.lt.u32.totalorder %s2573_s24, %s2901_s0 }
  0x3c   :  { %p2579_p12 = pnand %p2577_p11, %p2574_p10 }
  0x3e   :  { %2582 = shalt.err (!%p2579_p12)
}
  0x3f   :  { %s2583_s5 = scalar_lea.vmem %s24_s19, 128  ;;  %p2588_p0 = scmp.lt.s32.totalorder %s24_s19, %s24_s19 }
  0x40   :  { %p2584_p13 = scmp.ne.s32.totalorder %s24_s19, %s2583_s5  ;;  %p2589_p1 = scmp.lt.s32.totalorder %s2583_s5, %s2583_s5 }
  0x42   :  { %p2590_p2 = por %p2589_p1, %p2588_p0 }
  0x44   :  { %p2591_p3 = pnand %p2590_p2, %p2584_p13 }
  0x46   :  { %2594 = shalt.err (!%p2591_p3)
}
  0x47   :  { %26 = dma.hbm_to_vmem [thread:$0]  %s2901_s0, 128, %s24_s19, [#allocation3]  }
  0x48   :  { %s2595_s9 = scalar_lea.hbm %s2903_s2, 128 }
  0x49   :  { %p2596_p4 = scmp.ne.s32.totalorder %s2903_s2, %s2595_s9  ;;  %p2599_p5 = scmp.lt.u32.totalorder %s2595_s9, %s2903_s2 }
  0x4b   :  { %p2601_p6 = pnand %p2599_p5, %p2596_p4 }
  0x4d   :  { %2604 = shalt.err (!%p2601_p6)
}
  0x4e   :  { %s2605_s14 = scalar_lea.vmem %s46_s21, 128  ;;  %p2610_p8 = scmp.lt.s32.totalorder %s46_s21, %s46_s21 }
  0x4f   :  { %p2606_p7 = scmp.ne.s32.totalorder %s46_s21, %s2605_s14  ;;  %p2611_p9 = scmp.lt.s32.totalorder %s2605_s14, %s2605_s14 }
  0x51   :  { %p2612_p10 = por %p2611_p9, %p2610_p8 }
  0x53   :  { %p2613_p11 = pnand %p2612_p10, %p2606_p7 }
  0x55   :  { %2616 = shalt.err (!%p2613_p11)
}
  0x56   :  { %48 = dma.hbm_to_vmem [thread:$0]  %s2903_s2, 128, %s46_s21, [#allocation6]  }
  0x57   :  { %s2704_s15 = smov [#allocation10]   ;;  %s2705_s17 = smov [#allocation13]  }
  0x58   :  { %s67_s16 = sshll.u32 %s2704_s15, 4  ;;  %s89_s18 = sshll.u32 %s2705_s17, 4  ;;  %s68_s16 = int_to_ptr.vmem [resolvable:$true] %s67_s16  ;;  %s90_s18 = int_to_ptr.vmem [resolvable:$true] %s89_s18 }
  0x59   :  { %s2617_s22 = scalar_lea.hbm %s2905_s4, 64 }
  0x5a   :  { %p2618_p12 = scmp.ne.s32.totalorder %s2905_s4, %s2617_s22  ;;  %p2621_p13 = scmp.lt.u32.totalorder %s2617_s22, %s2905_s4 }
  0x5c   :  { %p2623_p0 = pnand %p2621_p13, %p2618_p12 }
  0x5e   :  { %2626 = shalt.err (!%p2623_p0)
}
  0x5f   :  { %s2627_s2 = scalar_lea.vmem %s68_s16, 64  ;;  %p2632_p2 = scmp.lt.s32.totalorder %s68_s16, %s68_s16 }
  0x60   :  { %p2628_p1 = scmp.ne.s32.totalorder %s68_s16, %s2627_s2  ;;  %p2633_p3 = scmp.lt.s32.totalorder %s2627_s2, %s2627_s2 }
  0x62   :  { %p2634_p4 = por %p2633_p3, %p2632_p2 }
  0x64   :  { %p2635_p5 = pnand %p2634_p4, %p2628_p1 }
  0x66   :  { %2638 = shalt.err (!%p2635_p5)
}
  0x67   :  { %70 = dma.hbm_to_vmem [thread:$0]  %s2905_s4, 64, %s68_s16, [#allocation9]  }
  0x68   :  { %s2639_s28 = scalar_lea.hbm %s2907_s6, 16 }
  0x69   :  { %p2640_p6 = scmp.ne.s32.totalorder %s2907_s6, %s2639_s28  ;;  %p2643_p7 = scmp.lt.u32.totalorder %s2639_s28, %s2907_s6 }
  0x6b   :  { %p2645_p8 = pnand %p2643_p7, %p2640_p6 }
  0x6d   :  { %2648 = shalt.err (!%p2645_p8)
}
  0x6e   :  { %s2649_s10 = scalar_lea.vmem %s90_s18, 16  ;;  %s2653_s11 = scalar_lea.vmem %s90_s18, 32 }
  0x6f   :  { %p2650_p9 = scmp.ne.s32.totalorder %s90_s18, %s2649_s10  ;;  %p2654_p10 = scmp.lt.s32.totalorder %s90_s18, %s90_s18 }
  0x70   :  { %p2655_p11 = scmp.lt.s32.totalorder %s2653_s11, %s2649_s10 }
  0x72   :  { %p2656_p12 = por %p2655_p11, %p2654_p10 }
  0x74   :  { %p2657_p13 = pnand %p2656_p12, %p2650_p9 }
  0x76   :  { %2660 = shalt.err (!%p2657_p13)
}
  0x77   :  { %92 = dma.hbm_to_vmem [thread:$0]  %s2907_s6, 16, %s90_s18, [#allocation12]  }
  0x78   :  { %2683 = dma.done.wait [#allocation3], 128  }
  0x79   :  { %2684 = vsyncadd [#allocation3], 4294967168 }
  0x7a   :  { %2685 = dma.done.wait [#allocation6], 2176  }
  0x7b   :  { %2686 = vsyncadd [#allocation6], 4294965120 }
  0x7c   :  { %2687 = dma.done.wait [#allocation9], 65600  }
  0x7d   :  { %2688 = vsyncadd [#allocation9], 4294901696 }
  0x7e   :  { %2689 = dma.done.wait [#allocation12], 8208  }
  0x7f   :  { %2690 = vsyncadd [#allocation12], 4294959088  ;;  %v2706_v0 = vmov 0.0   ;;  %v116_v1 = vld [vmem:[#allocation5 + $0x8] sm:$0xff]  ;;  %v115_v3 = vld [vmem:[#allocation5] sm:$0xff]  ;;  %vm173_vm0 = vcmask 130048  }
  0x80   :  { %241 = vmatprep.mubr.f32.mxu0 %v2706_v0  ;;  %312 = vmatprep.mubr.f32.mxu1 %v2706_v0  ;;  %v124_v2 = vld [vmem:[#allocation5 + $0x48] sm:$0xff]  ;;  %v123_v5 = vld [vmem:[#allocation5 + $0x40] sm:$0xff]  ;;  %v118_v6 = vld [vmem:[#allocation5 + $0x18] sm:$0xff]  ;;  %s2707_s6 = smov [#allocation14]  }
  0x81   :  { %v1881_v4 = vpack.c.bf16 %v124_v2, %v116_v1  ;;  %v1883_v7 = vpack.c.bf16 %v123_v5, %v115_v3  ;;  %v114_v8 = vld [vmem:[#allocation2] sm:$0xff]  ;;  %v117_v10 = vld [vmem:[#allocation5 + $0x10] sm:$0xff]  ;;  %v120_v14 = vld [vmem:[#allocation5 + $0x28] sm:$0xff]  ;;  %s1794_s13 = sshll.u32 %s2707_s6, 4  ;;  %s1795_s13 = int_to_ptr.vmem [resolvable:$true] %s1794_s13 }
  0x82   :  { %v126_v9 = vld [vmem:[#allocation5 + $0x58] sm:$0xff]  ;;  %v125_v11 = vld [vmem:[#allocation5 + $0x50] sm:$0xff]  ;;  %v128_v15 = vld [vmem:[#allocation5 + $0x68] sm:$0xff]  ;;  %s2661_s14 = scalar_lea.vmem %s1795_s13, 128  ;;  %p2666_p1 = scmp.lt.s32.totalorder %s1795_s13, %s1795_s13 }
  0x83   :  { %1882 = vmatprep.subr.bf16.mxu0 %v1881_v4  ;;  %v1885_v12 = vpack.c.bf16 %v126_v9, %v118_v6  ;;  %v1887_v13 = vpack.c.bf16 %v125_v11, %v117_v10  ;;  %v119_v16 = vld [vmem:[#allocation5 + $0x20] sm:$0xff]  ;;  %v1889_v17 = vpack.c.bf16 %v128_v15, %v120_v14  ;;  %v122_v19 = vld [vmem:[#allocation5 + $0x38] sm:$0xff]  ;;  %v121_v23 = vld [vmem:[#allocation5 + $0x30] sm:$0xff]  ;;  %p2662_p0 = scmp.ne.s32.totalorder %s1795_s13, %s2661_s14  ;;  %p2667_p2 = scmp.lt.s32.totalorder %s2661_s14, %s2661_s14 }
  0x84   :  { %1884 = vmatpush1.bf16.msra.mxu0 %v1883_v7  ;;  %v127_v18 = vld [vmem:[#allocation5 + $0x60] sm:$0xff]  ;;  %v130_v20 = vld [vmem:[#allocation5 + $0x78] sm:$0xff]  ;;  %v129_v24 = vld [vmem:[#allocation5 + $0x70] sm:$0xff] }
  0x85   :  { %1886 = vmatprep.subr.bf16.mxu1 %v1885_v12  ;;  %v1891_v21 = vpack.c.bf16 %v127_v18, %v119_v16  ;;  %v1893_v22 = vpack.c.bf16 %v130_v20, %v122_v19  ;;  %v470_v25 = vld [vmem:[#allocation8 + $0x8] sm:$0xff]  ;;  %1890 = vmatprep.subr.bf16.mxu0 %v1889_v17  ;;  %v1895_v26 = vpack.c.bf16 %v129_v24, %v121_v23  ;;  %v472_v28 = vld [vmem:[#allocation8 + $0x18] sm:$0xff]  ;;  %v469_v32 = vld [vmem:[#allocation8] sm:$0xff]  ;;  %p2668_p3 = por %p2667_p2, %p2666_p1 }
  0x86   :  { %1888 = vmatpush1.bf16.msra.mxu1 %v1887_v13  ;;  %v474_v27 = vld [vmem:[#allocation8 + $0x28] sm:$0xff]  ;;  %v476_v29 = vld [vmem:[#allocation8 + $0x38] sm:$0xff]  ;;  %v473_v33 = vld [vmem:[#allocation8 + $0x20] sm:$0xff] }
  0x87   :  { %1806 = vmatmul.mubr.msk.f32.vlgmr.msra.gmra.mrb[0].mxu0 %vm173_vm0, %v114_v8  ;;  %1894 = vmatprep.subr.bf16.mxu1 %v1893_v22  ;;  %v1897_v30 = vpack.c.bf16 %v474_v27, %v470_v25  ;;  %v2153_v31 = vpack.c.bf16 %v476_v29, %v472_v28  ;;  %v471_v34 = vld [vmem:[#allocation8 + $0x10] sm:$0xff]  ;;  %v1899_v35 = vpack.c.bf16 %v473_v33, %v469_v32  ;;  %v478_v37 = vld [vmem:[#allocation8 + $0x48] sm:$0xff]  ;;  %v480_v40 = vld [vmem:[#allocation8 + $0x58] sm:$0xff]  ;;  %p2669_p4 = pnand %p2668_p3, %p2662_p0 }
  0x88   :  { %1892 = vmatpush1.bf16.msra.mxu0 %v1891_v21  ;;  %383 = vmatprep.mubr.f32.mxu0 %v2706_v0  ;;  %v475_v36 = vld [vmem:[#allocation8 + $0x30] sm:$0xff]  ;;  %v482_v38 = vld [vmem:[#allocation8 + $0x68] sm:$0xff]  ;;  %v484_v41 = vld [vmem:[#allocation8 + $0x78] sm:$0xff] }
  0x89   :  { %1807 = vmatmul.mubr.msk.f32.vlgmr.msra.gmra.mrb[0].mxu1 %vm173_vm0, %v114_v8  ;;  %1898 = vmatprep.subr.bf16.mxu0 %v1897_v30  ;;  %v1901_v39 = vpack.c.bf16 %v482_v38, %v478_v37  ;;  %v477_v42 = vld [vmem:[#allocation8 + $0x40] sm:$0xff]  ;;  %v2155_v43 = vpack.c.bf16 %v475_v36, %v471_v34  ;;  %v479_v45 = vld [vmem:[#allocation8 + $0x50] sm:$0xff]  ;;  %v2157_v46 = vpack.c.bf16 %v484_v41, %v480_v40  ;;  %v486_v48 = vld [vmem:[#allocation8 + $0x88] sm:$0xff] }
  0x8a   :  { %1896 = vmatpush1.bf16.msra.mxu1 %v1895_v26  ;;  %454 = vmatprep.mubr.f32.mxu1 %v2706_v0  ;;  %v481_v44 = vld [vmem:[#allocation8 + $0x60] sm:$0xff]  ;;  %v483_v47 = vld [vmem:[#allocation8 + $0x70] sm:$0xff]  ;;  %v490_v49 = vld [vmem:[#allocation8 + $0xa8] sm:$0xff] }
  0x8b   :  { %1808 = vmatmul.mubr.msk.f32.vlgmr.msra.gmra.mrb[2].mxu0 %vm173_vm0, %v114_v8  ;;  %2154 = vmatprep.subr.bf16.mxu1 %v2153_v31  ;;  %v1903_v50 = vpack.c.bf16 %v481_v44, %v477_v42  ;;  %v488_v51 = vld [vmem:[#allocation8 + $0x98] sm:$0xff]  ;;  %v1905_v53 = vpack.c.bf16 %v490_v49, %v486_v48  ;;  %v485_v54 = vld [vmem:[#allocation8 + $0x80] sm:$0xff]  ;;  %v2159_v56 = vpack.c.bf16 %v483_v47, %v479_v45  ;;  %v494_v57 = vld [vmem:[#allocation8 + $0xc8] sm:$0xff] }
  0x8c   :  { %1900 = vmatpush1.bf16.msra.mxu0 %v1899_v35  ;;  %v492_v52 = vld [vmem:[#allocation8 + $0xb8] sm:$0xff]  ;;  %v489_v55 = vld [vmem:[#allocation8 + $0xa0] sm:$0xff]  ;;  %v498_v58 = vld [vmem:[#allocation8 + $0xe8] sm:$0xff] }
  0x8d   :  { %1809 = vmatmul.mubr.msk.f32.vlgmr.msra.gmra.mrb[2].mxu1 %vm173_vm0, %v114_v8  ;;  %1902 = vmatprep.subr.bf16.mxu0 %v1901_v39  ;;  %v2161_v59 = vpack.c.bf16 %v492_v52, %v488_v51  ;;  %v487_v60 = vld [vmem:[#allocation8 + $0x90] sm:$0xff]  ;;  %v1907_v62 = vpack.c.bf16 %v489_v55, %v485_v54  ;;  %v496_v63 = vld [vmem:[#allocation8 + $0xd8] sm:$0xff]  ;;  %v1909_v1 = vpack.c.bf16 %v498_v58, %v494_v57  ;;  %v493_v2 = vld [vmem:[#allocation8 + $0xc0] sm:$0xff] }
  0x8e   :  { %2156 = vmatpush1.bf16.msra.mxu1 %v2155_v43  ;;  %v491_v61 = vld [vmem:[#allocation8 + $0xb0] sm:$0xff]  ;;  %v500_v0 = vld [vmem:[#allocation8 + $0xf8] sm:$0xff]  ;;  %v497_v3 = vld [vmem:[#allocation8 + $0xe0] sm:$0xff] }
  0x8f   :  { %2158 = vmatprep.subr.bf16.mxu1 %v2157_v46  ;;  %v2163_v4 = vpack.c.bf16 %v491_v61, %v487_v60  ;;  %v502_v5 = vld [vmem:[#allocation8 + $0x108] sm:$0xff]  ;;  %v2165_v7 = vpack.c.bf16 %v500_v0, %v496_v63  ;;  %v495_v8 = vld [vmem:[#allocation8 + $0xd0] sm:$0xff]  ;;  %v1911_v10 = vpack.c.bf16 %v497_v3, %v493_v2  ;;  %v504_v11 = vld [vmem:[#allocation8 + $0x118] sm:$0xff] }
  0x90   :  { %1904 = vmatpush1.bf16.msra.mxu0 %v1903_v50  ;;  %v506_v6 = vld [vmem:[#allocation8 + $0x128] sm:$0xff]  ;;  %v499_v9 = vld [vmem:[#allocation8 + $0xf0] sm:$0xff]  ;;  %v508_v12 = vld [vmem:[#allocation8 + $0x138] sm:$0xff] }
  0x91   :  { %1906 = vmatprep.subr.bf16.mxu0 %v1905_v53  ;;  %v1913_v13 = vpack.c.bf16 %v506_v6, %v502_v5  ;;  %v501_v14 = vld [vmem:[#allocation8 + $0x100] sm:$0xff]  ;;  %v2167_v16 = vpack.c.bf16 %v499_v9, %v495_v8  ;;  %v510_v17 = vld [vmem:[#allocation8 + $0x148] sm:$0xff]  ;;  %v2169_v19 = vpack.c.bf16 %v508_v12, %v504_v11  ;;  %v503_v20 = vld [vmem:[#allocation8 + $0x110] sm:$0xff] }
  0x92   :  { %2160 = vmatpush1.bf16.msra.mxu1 %v2159_v56  ;;  %v505_v15 = vld [vmem:[#allocation8 + $0x120] sm:$0xff]  ;;  %v514_v18 = vld [vmem:[#allocation8 + $0x168] sm:$0xff]  ;;  %v507_v21 = vld [vmem:[#allocation8 + $0x130] sm:$0xff] }
  0x93   :  { %2162 = vmatprep.subr.bf16.mxu1 %v2161_v59  ;;  %v1915_v22 = vpack.c.bf16 %v505_v15, %v501_v14  ;;  %v512_v23 = vld [vmem:[#allocation8 + $0x158] sm:$0xff]  ;;  %v1917_v25 = vpack.c.bf16 %v514_v18, %v510_v17  ;;  %v509_v26 = vld [vmem:[#allocation8 + $0x140] sm:$0xff]  ;;  %v2171_v28 = vpack.c.bf16 %v507_v21, %v503_v20  ;;  %v518_v29 = vld [vmem:[#allocation8 + $0x188] sm:$0xff] }
  0x94   :  { %1908 = vmatpush1.bf16.msra.mxu0 %v1907_v62  ;;  %v516_v24 = vld [vmem:[#allocation8 + $0x178] sm:$0xff]  ;;  %v513_v27 = vld [vmem:[#allocation8 + $0x160] sm:$0xff]  ;;  %v522_v30 = vld [vmem:[#allocation8 + $0x1a8] sm:$0xff] }
  0x95   :  { %1910 = vmatprep.subr.bf16.mxu0 %v1909_v1  ;;  %v2173_v31 = vpack.c.bf16 %v516_v24, %v512_v23  ;;  %v511_v32 = vld [vmem:[#allocation8 + $0x150] sm:$0xff]  ;;  %v1919_v34 = vpack.c.bf16 %v513_v27, %v509_v26  ;;  %v520_v35 = vld [vmem:[#allocation8 + $0x198] sm:$0xff]  ;;  %v1921_v37 = vpack.c.bf16 %v522_v30, %v518_v29  ;;  %v517_v38 = vld [vmem:[#allocation8 + $0x180] sm:$0xff] }
  0x96   :  { %2164 = vmatpush1.bf16.msra.mxu1 %v2163_v4  ;;  %v515_v33 = vld [vmem:[#allocation8 + $0x170] sm:$0xff]  ;;  %v524_v36 = vld [vmem:[#allocation8 + $0x1b8] sm:$0xff]  ;;  %v521_v39 = vld [vmem:[#allocation8 + $0x1a0] sm:$0xff] }
  0x97   :  { %2166 = vmatprep.subr.bf16.mxu1 %v2165_v7  ;;  %v2175_v40 = vpack.c.bf16 %v515_v33, %v511_v32  ;;  %v526_v41 = vld [vmem:[#allocation8 + $0x1c8] sm:$0xff]  ;;  %v2177_v43 = vpack.c.bf16 %v524_v36, %v520_v35  ;;  %v519_v44 = vld [vmem:[#allocation8 + $0x190] sm:$0xff]  ;;  %v1923_v46 = vpack.c.bf16 %v521_v39, %v517_v38  ;;  %v528_v47 = vld [vmem:[#allocation8 + $0x1d8] sm:$0xff] }
  0x98   :  { %1912 = vmatpush1.bf16.msra.mxu0 %v1911_v10  ;;  %v530_v42 = vld [vmem:[#allocation8 + $0x1e8] sm:$0xff]  ;;  %v523_v45 = vld [vmem:[#allocation8 + $0x1b0] sm:$0xff]  ;;  %v532_v48 = vld [vmem:[#allocation8 + $0x1f8] sm:$0xff] }
  0x99   :  { %1914 = vmatprep.subr.bf16.mxu0 %v1913_v13  ;;  %v1925_v49 = vpack.c.bf16 %v530_v42, %v526_v41  ;;  %v525_v50 = vld [vmem:[#allocation8 + $0x1c0] sm:$0xff]  ;;  %v2179_v52 = vpack.c.bf16 %v523_v45, %v519_v44  ;;  %v534_v53 = vld [vmem:[#allocation8 + $0x208] sm:$0xff]  ;;  %v2181_v55 = vpack.c.bf16 %v532_v48, %v528_v47  ;;  %v527_v56 = vld [vmem:[#allocation8 + $0x1d0] sm:$0xff] }
  0x9a   :  { %2168 = vmatpush1.bf16.msra.mxu1 %v2167_v16  ;;  %v529_v51 = vld [vmem:[#allocation8 + $0x1e0] sm:$0xff]  ;;  %v538_v54 = vld [vmem:[#allocation8 + $0x228] sm:$0xff]  ;;  %v531_v57 = vld [vmem:[#allocation8 + $0x1f0] sm:$0xff] }
  0x9b   :  { %2170 = vmatprep.subr.bf16.mxu1 %v2169_v19  ;;  %v1927_v58 = vpack.c.bf16 %v529_v51, %v525_v50  ;;  %v536_v59 = vld [vmem:[#allocation8 + $0x218] sm:$0xff]  ;;  %v1929_v61 = vpack.c.bf16 %v538_v54, %v534_v53  ;;  %v533_v62 = vld [vmem:[#allocation8 + $0x200] sm:$0xff]  ;;  %v2183_v0 = vpack.c.bf16 %v531_v57, %v527_v56  ;;  %v542_v1 = vld [vmem:[#allocation8 + $0x248] sm:$0xff] }
  0x9c   :  { %1916 = vmatpush1.bf16.msra.mxu0 %v1915_v22  ;;  %v540_v60 = vld [vmem:[#allocation8 + $0x238] sm:$0xff]  ;;  %v537_v63 = vld [vmem:[#allocation8 + $0x220] sm:$0xff]  ;;  %v546_v2 = vld [vmem:[#allocation8 + $0x268] sm:$0xff] }
  0x9d   :  { %1918 = vmatprep.subr.bf16.mxu0 %v1917_v25  ;;  %v2185_v3 = vpack.c.bf16 %v540_v60, %v536_v59  ;;  %v535_v4 = vld [vmem:[#allocation8 + $0x210] sm:$0xff]  ;;  %v1931_v6 = vpack.c.bf16 %v537_v63, %v533_v62  ;;  %v544_v7 = vld [vmem:[#allocation8 + $0x258] sm:$0xff]  ;;  %v1933_v9 = vpack.c.bf16 %v546_v2, %v542_v1  ;;  %v541_v10 = vld [vmem:[#allocation8 + $0x240] sm:$0xff] }
  0x9e   :  { %2172 = vmatpush1.bf16.msra.mxu1 %v2171_v28  ;;  %v539_v5 = vld [vmem:[#allocation8 + $0x230] sm:$0xff]  ;;  %v548_v8 = vld [vmem:[#allocation8 + $0x278] sm:$0xff]  ;;  %v545_v11 = vld [vmem:[#allocation8 + $0x260] sm:$0xff] }
  0x9f   :  { %2174 = vmatprep.subr.bf16.mxu1 %v2173_v31  ;;  %v2187_v12 = vpack.c.bf16 %v539_v5, %v535_v4  ;;  %v550_v13 = vld [vmem:[#allocation8 + $0x288] sm:$0xff]  ;;  %v2189_v15 = vpack.c.bf16 %v548_v8, %v544_v7  ;;  %v543_v16 = vld [vmem:[#allocation8 + $0x250] sm:$0xff]  ;;  %v1935_v18 = vpack.c.bf16 %v545_v11, %v541_v10  ;;  %v552_v19 = vld [vmem:[#allocation8 + $0x298] sm:$0xff] }
  0xa0   :  { %1920 = vmatpush1.bf16.msra.mxu0 %v1919_v34  ;;  %v554_v14 = vld [vmem:[#allocation8 + $0x2a8] sm:$0xff]  ;;  %v547_v17 = vld [vmem:[#allocation8 + $0x270] sm:$0xff]  ;;  %v556_v20 = vld [vmem:[#allocation8 + $0x2b8] sm:$0xff] }
  0xa1   :  { %1922 = vmatprep.subr.bf16.mxu0 %v1921_v37  ;;  %v1937_v21 = vpack.c.bf16 %v554_v14, %v550_v13  ;;  %v549_v22 = vld [vmem:[#allocation8 + $0x280] sm:$0xff]  ;;  %v2191_v24 = vpack.c.bf16 %v547_v17, %v543_v16  ;;  %v558_v25 = vld [vmem:[#allocation8 + $0x2c8] sm:$0xff]  ;;  %v2193_v27 = vpack.c.bf16 %v556_v20, %v552_v19  ;;  %v551_v28 = vld [vmem:[#allocation8 + $0x290] sm:$0xff] }
  0xa2   :  { %2176 = vmatpush1.bf16.msra.mxu1 %v2175_v40  ;;  %v553_v23 = vld [vmem:[#allocation8 + $0x2a0] sm:$0xff]  ;;  %v562_v26 = vld [vmem:[#allocation8 + $0x2e8] sm:$0xff]  ;;  %v555_v29 = vld [vmem:[#allocation8 + $0x2b0] sm:$0xff] }
  0xa3   :  { %2178 = vmatprep.subr.bf16.mxu1 %v2177_v43  ;;  %v1939_v30 = vpack.c.bf16 %v553_v23, %v549_v22  ;;  %v560_v31 = vld [vmem:[#allocation8 + $0x2d8] sm:$0xff]  ;;  %v1941_v33 = vpack.c.bf16 %v562_v26, %v558_v25  ;;  %v557_v34 = vld [vmem:[#allocation8 + $0x2c0] sm:$0xff]  ;;  %v2195_v36 = vpack.c.bf16 %v555_v29, %v551_v28  ;;  %v566_v37 = vld [vmem:[#allocation8 + $0x308] sm:$0xff] }
  0xa4   :  { %1924 = vmatpush1.bf16.msra.mxu0 %v1923_v46  ;;  %v564_v32 = vld [vmem:[#allocation8 + $0x2f8] sm:$0xff]  ;;  %v561_v35 = vld [vmem:[#allocation8 + $0x2e0] sm:$0xff]  ;;  %v570_v38 = vld [vmem:[#allocation8 + $0x328] sm:$0xff] }
  0xa5   :  { %1926 = vmatprep.subr.bf16.mxu0 %v1925_v49  ;;  %v2197_v39 = vpack.c.bf16 %v564_v32, %v560_v31  ;;  %v559_v40 = vld [vmem:[#allocation8 + $0x2d0] sm:$0xff]  ;;  %v1943_v42 = vpack.c.bf16 %v561_v35, %v557_v34  ;;  %v568_v43 = vld [vmem:[#allocation8 + $0x318] sm:$0xff]  ;;  %v1945_v45 = vpack.c.bf16 %v570_v38, %v566_v37  ;;  %v565_v46 = vld [vmem:[#allocation8 + $0x300] sm:$0xff]  ;;  %v133_v32 = vlaneseq }
  0xa6   :  { %2180 = vmatpush1.bf16.msra.mxu1 %v2179_v52  ;;  %v563_v41 = vld [vmem:[#allocation8 + $0x2f0] sm:$0xff]  ;;  %v572_v44 = vld [vmem:[#allocation8 + $0x338] sm:$0xff]  ;;  %v569_v47 = vld [vmem:[#allocation8 + $0x320] sm:$0xff] }
  0xa7   :  { %2182 = vmatprep.subr.bf16.mxu1 %v2181_v55  ;;  %v2199_v48 = vpack.c.bf16 %v563_v41, %v559_v40  ;;  %v574_v49 = vld [vmem:[#allocation8 + $0x348] sm:$0xff]  ;;  %v2201_v51 = vpack.c.bf16 %v572_v44, %v568_v43  ;;  %v567_v52 = vld [vmem:[#allocation8 + $0x310] sm:$0xff]  ;;  %v1947_v54 = vpack.c.bf16 %v569_v47, %v565_v46  ;;  %v576_v55 = vld [vmem:[#allocation8 + $0x358] sm:$0xff] }
  0xa8   :  { %1928 = vmatpush1.bf16.msra.mxu0 %v1927_v58  ;;  %v578_v50 = vld [vmem:[#allocation8 + $0x368] sm:$0xff]  ;;  %v571_v53 = vld [vmem:[#allocation8 + $0x330] sm:$0xff]  ;;  %v580_v56 = vld [vmem:[#allocation8 + $0x378] sm:$0xff] }
  0xa9   :  { %1930 = vmatprep.subr.bf16.mxu0 %v1929_v61  ;;  %v1949_v57 = vpack.c.bf16 %v578_v50, %v574_v49  ;;  %v573_v58 = vld [vmem:[#allocation8 + $0x340] sm:$0xff]  ;;  %v2203_v60 = vpack.c.bf16 %v571_v53, %v567_v52  ;;  %v582_v61 = vld [vmem:[#allocation8 + $0x388] sm:$0xff]  ;;  %v2205_v63 = vpack.c.bf16 %v580_v56, %v576_v55  ;;  %v579_v1 = vld [vmem:[#allocation8 + $0x370] sm:$0xff] }
  0xaa   :  { %2184 = vmatpush1.bf16.msra.mxu1 %v2183_v0  ;;  %v577_v59 = vld [vmem:[#allocation8 + $0x360] sm:$0xff]  ;;  %v586_v62 = vld [vmem:[#allocation8 + $0x3a8] sm:$0xff]  ;;  %v575_v0 = vld [vmem:[#allocation8 + $0x350] sm:$0xff] }
  0xab   :  { %2186 = vmatprep.subr.bf16.mxu1 %v2185_v3  ;;  %v1951_v2 = vpack.c.bf16 %v577_v59, %v573_v58  ;;  %v584_v3 = vld [vmem:[#allocation8 + $0x398] sm:$0xff]  ;;  %v1953_v5 = vpack.c.bf16 %v586_v62, %v582_v61  ;;  %v585_v7 = vld [vmem:[#allocation8 + $0x3a0] sm:$0xff]  ;;  %v2207_v8 = vpack.c.bf16 %v579_v1, %v575_v0  ;;  %v583_v10 = vld [vmem:[#allocation8 + $0x390] sm:$0xff] }
  0xac   :  { %1932 = vmatpush1.bf16.msra.mxu0 %v1931_v6  ;;  %v588_v4 = vld [vmem:[#allocation8 + $0x3b8] sm:$0xff]  ;;  %v581_v6 = vld [vmem:[#allocation8 + $0x380] sm:$0xff]  ;;  %v587_v11 = vld [vmem:[#allocation8 + $0x3b0] sm:$0xff] }
  0xad   :  { %1934 = vmatprep.subr.bf16.mxu0 %v1933_v9  ;;  %v2209_v9 = vpack.c.bf16 %v588_v4, %v584_v3  ;;  %v2211_v13 = vpack.c.bf16 %v587_v11, %v583_v10  ;;  %v590_v14 = vld [vmem:[#allocation8 + $0x3c8] sm:$0xff]  ;;  %v592_v16 = vld [vmem:[#allocation8 + $0x3d8] sm:$0xff]  ;;  %v589_v19 = vld [vmem:[#allocation8 + $0x3c0] sm:$0xff] }
  0xae   :  { %2188 = vmatpush1.bf16.msra.mxu1 %v2187_v12  ;;  %v1955_v12 = vpack.c.bf16 %v585_v7, %v581_v6  ;;  %v593_v20 = vld [vmem:[#allocation8 + $0x3e0] sm:$0xff]  ;;  %v591_v23 = vld [vmem:[#allocation8 + $0x3d0] sm:$0xff]  ;;  %v598_v26 = vld [vmem:[#allocation8 + $0x408] sm:$0xff] }
  0xaf   :  { %2190 = vmatprep.subr.bf16.mxu1 %v2189_v15  ;;  %v594_v15 = vld [vmem:[#allocation8 + $0x3e8] sm:$0xff]  ;;  %v1959_v22 = vpack.c.bf16 %v593_v20, %v589_v19  ;;  %v600_v28 = vld [vmem:[#allocation8 + $0x418] sm:$0xff]  ;;  %v597_v41 = vld [vmem:[#allocation8 + $0x400] sm:$0xff] }
  0xb0   :  { %1936 = vmatpush1.bf16.msra.mxu0 %v1935_v18  ;;  %v1957_v17 = vpack.c.bf16 %v594_v15, %v590_v14  ;;  %v596_v18 = vld [vmem:[#allocation8 + $0x3f8] sm:$0xff]  ;;  %v599_v46 = vld [vmem:[#allocation8 + $0x410] sm:$0xff]  ;;  %v610_v50 = vld [vmem:[#allocation8 + $0x468] sm:$0xff] }
  0xb1   :  { %1938 = vmatprep.subr.bf16.mxu0 %v1937_v21  ;;  %v2213_v21 = vpack.c.bf16 %v596_v18, %v592_v16  ;;  %v2839_v35 = vld [vmem:[#allocation7] sm:$0xff]  ;;  %v603_v47 = vld [vmem:[#allocation8 + $0x430] sm:$0xff]  ;;  %v605_v58 = vld [vmem:[#allocation8 + $0x440] sm:$0xff] }
  0xb2   :  { %2192 = vmatpush1.bf16.msra.mxu1 %v2191_v24  ;;  %v595_v24 = vld [vmem:[#allocation8 + $0x3f0] sm:$0xff]  ;;  %v612_v52 = vld [vmem:[#allocation8 + $0x478] sm:$0xff]  ;;  %v609_v59 = vld [vmem:[#allocation8 + $0x460] sm:$0xff] }
  0xb3   :  { %2194 = vmatprep.subr.bf16.mxu1 %v2193_v27  ;;  %v2215_v25 = vpack.c.bf16 %v595_v24, %v591_v23  ;;  %v602_v27 = vld [vmem:[#allocation8 + $0x428] sm:$0xff]  ;;  %v607_v1 = vld [vmem:[#allocation8 + $0x450] sm:$0xff]  ;;  %v616_v6 = vld [vmem:[#allocation8 + $0x498] sm:$0xff] }
  0xb4   :  { %1940 = vmatpush1.bf16.msra.mxu0 %v1939_v30  ;;  %v1961_v29 = vpack.c.bf16 %v602_v27, %v598_v26  ;;  %v604_v30 = vld [vmem:[#allocation8 + $0x438] sm:$0xff]  ;;  %v614_v3 = vld [vmem:[#allocation8 + $0x488] sm:$0xff]  ;;  %v613_v11 = vld [vmem:[#allocation8 + $0x480] sm:$0xff] }
  0xb5   :  { %1942 = vmatprep.subr.bf16.mxu0 %v1941_v33  ;;  %v2217_v31 = vpack.c.bf16 %v604_v30, %v600_v28  ;;  %v2836_v33 = vshrl.u32 %v133_v32, 7  ;;  %v620_v7 = vld [vmem:[#allocation8 + $0x4b8] sm:$0xff]  ;;  %v615_v15 = vld [vmem:[#allocation8 + $0x490] sm:$0xff]  ;;  %v626_v18 = vld [vmem:[#allocation8 + $0x4e8] sm:$0xff] }
  0xb6   :  { %2196 = vmatpush1.bf16.msra.mxu1 %v2195_v36  ;;  %v2225_v14 = vpack.c.bf16 %v620_v7, %v616_v6  ;;  %v619_v16 = vld [vmem:[#allocation8 + $0x4b0] sm:$0xff]  ;;  %v624_v19 = vld [vmem:[#allocation8 + $0x4d8] sm:$0xff]  ;;  %v621_v23 = vld [vmem:[#allocation8 + $0x4c0] sm:$0xff] }
  0xb7   :  { %2198 = vmatprep.subr.bf16.mxu1 %v2197_v39  ;;  %v135_v34 = vsub.s32 0, %v2836_v33  ;;  %v139_v36 = vsub.s32 1, %v2836_v33  ;;  %v147_v37 = vsub.s32 3, %v2836_v33  ;;  %v628_v20 = vld [vmem:[#allocation8 + $0x4f8] sm:$0xff]  ;;  %v625_v24 = vld [vmem:[#allocation8 + $0x4e0] sm:$0xff]  ;;  %v623_v27 = vld [vmem:[#allocation8 + $0x4d0] sm:$0xff] }
  0xb8   :  { %1944 = vmatpush1.bf16.msra.mxu0 %v1943_v42  ;;  %v601_v42 = vld [vmem:[#allocation8 + $0x420] sm:$0xff]  ;;  %v2229_v26 = vpack.c.bf16 %v628_v20, %v624_v19  ;;  %v627_v28 = vld [vmem:[#allocation8 + $0x4f0] sm:$0xff]  ;;  %v634_v30 = vld [vmem:[#allocation8 + $0x528] sm:$0xff] }
  0xb9   :  { %1946 = vmatprep.subr.bf16.mxu0 %v1945_v45  ;;  %v136_v38 = vrot.slane %v2839_v35, %v135_v34  ;;  %v140_v39 = vrot.slane %v2839_v35, %v139_v36  ;;  %v148_v43 = vrot.slane %v2839_v35, %v147_v37  ;;  %v1963_v56 = vpack.c.bf16 %v601_v42, %v597_v41  ;;  %v636_v32 = vld [vmem:[#allocation8 + $0x538] sm:$0xff]  ;;  %v633_v41 = vld [vmem:[#allocation8 + $0x520] sm:$0xff]  ;;  %v647_v7 = vld [vmem:[#allocation8 + $0x590] sm:$0xff] }
  0xba   :  { %2200 = vmatpush1.bf16.msra.mxu1 %v2199_v48  ;;  %v606_v48 = vld [vmem:[#allocation8 + $0x448] sm:$0xff] }
  0xbb   :  { %2202 = vmatprep.subr.bf16.mxu1 %v2201_v51  ;;  %v608_v51 = vld [vmem:[#allocation8 + $0x458] sm:$0xff] }
  0xbc   :  { %1948 = vmatpush1.bf16.msra.mxu0 %v1947_v54  ;;  %v2221_v0 = vpack.c.bf16 %v612_v52, %v608_v51  ;;  %v637_v52 = vld [vmem:[#allocation8 + $0x540] sm:$0xff] }
  0xbd   :  { %1950 = vmatprep.subr.bf16.mxu0 %v1949_v57  ;;  %v2219_v57 = vpack.c.bf16 %v603_v47, %v599_v46  ;;  %v638_v46 = vld [vmem:[#allocation8 + $0x548] sm:$0xff] }
  0xbe   :  { %2204 = vmatpush1.bf16.msra.mxu1 %v2203_v60  ;;  %v642_v47 = vld [vmem:[#allocation8 + $0x568] sm:$0xff] }
  0xbf   :  { %2206 = vmatprep.subr.bf16.mxu1 %v2205_v63  ;;  %v1965_v63 = vpack.c.bf16 %v610_v50, %v606_v48  ;;  %v640_v48 = vld [vmem:[#allocation8 + $0x558] sm:$0xff] }
  0xc0   :  { %1952 = vmatpush1.bf16.msra.mxu0 %v1951_v2  ;;  %v611_v2 = vld [vmem:[#allocation8 + $0x470] sm:$0xff] }
  0xc1   :  { %1954 = vmatprep.subr.bf16.mxu0 %v1953_v5  ;;  %v618_v5 = vld [vmem:[#allocation8 + $0x4a8] sm:$0xff]  ;;  %v2223_v10 = vpack.c.bf16 %v611_v2, %v607_v1  ;;  %v645_v2 = vld [vmem:[#allocation8 + $0x580] sm:$0xff] }
  0xc2   :  { %2208 = vmatpush1.bf16.msra.mxu1 %v2207_v8 }
  0xc3   :  { %2210 = vmatprep.subr.bf16.mxu1 %v2209_v9  ;;  %v1967_v9 = vpack.c.bf16 %v609_v59, %v605_v58  ;;  %v643_v58 = vld [vmem:[#allocation8 + $0x570] sm:$0xff]  ;;  %v646_v59 = vld [vmem:[#allocation8 + $0x588] sm:$0xff] }
  0xc4   :  { %1956 = vmatpush1.bf16.msra.mxu0 %v1955_v12  ;;  %v617_v12 = vld [vmem:[#allocation8 + $0x4a0] sm:$0xff] }
  0xc5   :  { %1958 = vmatprep.subr.bf16.mxu0 %v1957_v17  ;;  %v622_v17 = vld [vmem:[#allocation8 + $0x4c8] sm:$0xff] }
  0xc6   :  { %2212 = vmatpush1.bf16.msra.mxu1 %v2211_v13  ;;  %v1969_v13 = vpack.c.bf16 %v618_v5, %v614_v3  ;;  %v649_v3 = vld [vmem:[#allocation8 + $0x5a0] sm:$0xff] }
  0xc7   :  { %2214 = vmatprep.subr.bf16.mxu1 %v2213_v21  ;;  %v1971_v21 = vpack.c.bf16 %v617_v12, %v613_v11  ;;  %v658_v11 = vld [vmem:[#allocation8 + $0x5e8] sm:$0xff]  ;;  %v656_v12 = vld [vmem:[#allocation8 + $0x5d8] sm:$0xff] }
  0xc8   :  { %1960 = vmatpush1.bf16.msra.mxu0 %v1959_v22  ;;  %v2227_v22 = vpack.c.bf16 %v619_v16, %v615_v15  ;;  %v653_v16 = vld [vmem:[#allocation8 + $0x5c0] sm:$0xff] }
  0xc9   :  { %1962 = vmatprep.subr.bf16.mxu0 %v1961_v29  ;;  %v630_v29 = vld [vmem:[#allocation8 + $0x508] sm:$0xff] }
  0xca   :  { %2216 = vmatpush1.bf16.msra.mxu1 %v2215_v25  ;;  %v1973_v25 = vpack.c.bf16 %v626_v18, %v622_v17  ;;  %v1977_v42 = vpack.c.bf16 %v634_v30, %v630_v29  ;;  %v657_v17 = vld [vmem:[#allocation8 + $0x5e0] sm:$0xff] }
  0xcb   :  { %2218 = vmatprep.subr.bf16.mxu1 %v2217_v31  ;;  %v632_v31 = vld [vmem:[#allocation8 + $0x518] sm:$0xff]  ;;  %v661_v29 = vld [vmem:[#allocation8 + $0x600] sm:$0xff] }
  0xcc   :  { %v665_v30 = vld [vmem:[#allocation8 + $0x620] sm:$0xff] }
 0x15a   :  { %v243_v40 = vpop.f32.mrb[0].mxu0 }
 0x15b   :  { %v244_v44 = vadd.f32 %v243_v40, %v136_v38  ;;  %v245_v45 = vpop.f32.mrb[1].mxu0  ;;  %v1975_v38 = vpack.c.bf16 %v625_v24, %v621_v23  ;;  %v629_v40 = vld [vmem:[#allocation8 + $0x500] sm:$0xff]  ;;  %v662_v23 = vld [vmem:[#allocation8 + $0x608] sm:$0xff] }
 0x15c   :  { %v246_v49 = vadd.f32 %v245_v45, %v140_v39  ;;  %v2852_v53 = vpop.f32.mrb[0].mxu1  ;;  %v2231_v39 = vpack.c.bf16 %v627_v28, %v623_v27  ;;  %v635_v45 = vld [vmem:[#allocation8 + $0x530] sm:$0xff]  ;;  %v1979_v50 = vpack.c.bf16 %v633_v41, %v629_v40  ;;  %v666_v24 = vld [vmem:[#allocation8 + $0x628] sm:$0xff]  ;;  %v1991_v27 = vpack.c.bf16 %v657_v17, %v653_v16 }
 0x15d   :  { %v316_v54 = vpop.f32.mrb[1].mxu1  ;;  %v461_v62 = vmax.f32 %v244_v44, 0.0  ;;  %v631_v44 = vld [vmem:[#allocation8 + $0x510] sm:$0xff]  ;;  %v670_v40 = vld [vmem:[#allocation8 + $0x648] sm:$0xff] }
 0x15e   :  { %v462_v55 = vmax.f32 %v246_v49, 0.0  ;;  %v317_v60 = vadd.f32 %v316_v54, %v148_v43  ;;  %v2854_v61 = vpop.f32.mrb[2].mxu0  ;;  %v2233_v43 = vpack.c.bf16 %v636_v32, %v632_v31  ;;  %v644_v49 = vld [vmem:[#allocation8 + $0x578] sm:$0xff]  ;;  %v2235_v51 = vpack.c.bf16 %v635_v45, %v631_v44  ;;  %v641_v54 = vld [vmem:[#allocation8 + $0x560] sm:$0xff]  ;;  %v674_v41 = vld [vmem:[#allocation8 + $0x668] sm:$0xff] }
 0x15f   :  { %v2856_v4 = vpop.f32.mrb[3].mxu0  ;;  %v1993_v31 = vpack.c.bf16 %v666_v24, %v662_v23  ;;  %v1995_v44 = vpack.c.bf16 %v665_v30, %v661_v29  ;;  %v694_v16 = vld [vmem:[#allocation8 + $0x708] sm:$0xff]  ;;  %v693_v23 = vld [vmem:[#allocation8 + $0x700] sm:$0xff] }
 0x160   :  { %1067 = vmatprep.mubr.f32.mxu0 %v462_v55  ;;  %1351 = vmatprep.mubr.f32.mxu1 %v462_v55  ;;  %v464_v8 = vmax.f32 %v317_v60, 0.0  ;;  %v1981_v55 = vpack.c.bf16 %v642_v47, %v638_v46  ;;  %v650_v60 = vld [vmem:[#allocation8 + $0x5a8] sm:$0xff]  ;;  %v669_v46 = vld [vmem:[#allocation8 + $0x640] sm:$0xff] }
 0x161   :  { %1068 = vmatmul.mubr.f32.vlgmr.msra.gmra.mrb[4].mxu0 %v461_v62  ;;  %1352 = vmatmul.mubr.f32.vlgmr.msra.gmra.mrb[4].mxu1 %v461_v62  ;;  %v648_v62 = vld [vmem:[#allocation8 + $0x598] sm:$0xff]  ;;  %v1985_v5 = vpack.c.bf16 %v650_v60, %v646_v59  ;;  %v673_v47 = vld [vmem:[#allocation8 + $0x660] sm:$0xff]  ;;  %v698_v17 = vld [vmem:[#allocation8 + $0x728] sm:$0xff] }
 0x162   :  { %1964 = vmatpush1.bf16.msra.mxu0 %v1963_v56  ;;  %2220 = vmatpush1.bf16.msra.mxu1 %v2219_v57  ;;  %v2237_v56 = vpack.c.bf16 %v644_v49, %v640_v48  ;;  %v639_v57 = vld [vmem:[#allocation8 + $0x550] sm:$0xff]  ;;  %v1997_v48 = vpack.c.bf16 %v674_v41, %v670_v40  ;;  %v677_v59 = vld [vmem:[#allocation8 + $0x680] sm:$0xff]  ;;  %v702_v29 = vld [vmem:[#allocation8 + $0x748] sm:$0xff] }
 0x163   :  { %1966 = vmatprep.subr.bf16.mxu0 %v1965_v63  ;;  %2222 = vmatprep.subr.bf16.mxu1 %v2221_v0  ;;  %v652_v63 = vld [vmem:[#allocation8 + $0x5b8] sm:$0xff]  ;;  %v1983_v0 = vpack.c.bf16 %v641_v54, %v637_v52  ;;  %v2239_v1 = vpack.c.bf16 %v643_v58, %v639_v57  ;;  %v678_v52 = vld [vmem:[#allocation8 + $0x688] sm:$0xff]  ;;  %v1999_v57 = vpack.c.bf16 %v673_v47, %v669_v46  ;;  %v681_v60 = vld [vmem:[#allocation8 + $0x6a0] sm:$0xff] }
 0x164   :  { %1138 = vmatprep.mubr.f32.mxu0 %v464_v8  ;;  %1422 = vmatprep.mubr.f32.mxu1 %v464_v8  ;;  %v2241_v6 = vpack.c.bf16 %v652_v63, %v648_v62  ;;  %v651_v8 = vld [vmem:[#allocation8 + $0x5b0] sm:$0xff]  ;;  %v682_v54 = vld [vmem:[#allocation8 + $0x6a8] sm:$0xff]  ;;  %v697_v24 = vld [vmem:[#allocation8 + $0x720] sm:$0xff] }
 0x165   :  { %v2243_v15 = vpack.c.bf16 %v651_v8, %v647_v7  ;;  %v2001_v62 = vpack.c.bf16 %v682_v54, %v678_v52  ;;  %v2003_v7 = vpack.c.bf16 %v681_v60, %v677_v59  ;;  %v706_v30 = vld [vmem:[#allocation8 + $0x768] sm:$0xff]  ;;  %v701_v40 = vld [vmem:[#allocation8 + $0x740] sm:$0xff]  ;;  %v715_v59 = vld [vmem:[#allocation8 + $0x7b0] sm:$0xff] }
 0x166   :  { %1968 = vmatpush1.bf16.msra.mxu0 %v1967_v9  ;;  %2224 = vmatpush1.bf16.msra.mxu1 %v2223_v10  ;;  %v654_v9 = vld [vmem:[#allocation8 + $0x5c8] sm:$0xff]  ;;  %v2858_v10 = vpop.f32.mrb[2].mxu1  ;;  %v705_v41 = vld [vmem:[#allocation8 + $0x760] sm:$0xff] }
 0x167   :  { %1970 = vmatprep.subr.bf16.mxu0 %v1969_v13  ;;  %2226 = vmatprep.subr.bf16.mxu1 %v2225_v14  ;;  %v660_v13 = vld [vmem:[#allocation8 + $0x5f8] sm:$0xff]  ;;  %v1987_v14 = vpack.c.bf16 %v649_v3, %v645_v2  ;;  %v2860_v18 = vpop.f32.mrb[3].mxu1  ;;  %v1989_v19 = vpack.c.bf16 %v658_v11, %v654_v9  ;;  %v686_v2 = vld [vmem:[#allocation8 + $0x6c8] sm:$0xff]  ;;  %v685_v9 = vld [vmem:[#allocation8 + $0x6c0] sm:$0xff] }
 0x168   :  { %v2245_v20 = vpack.c.bf16 %v660_v13, %v656_v12  ;;  %v690_v3 = vld [vmem:[#allocation8 + $0x6e8] sm:$0xff]  ;;  %v689_v11 = vld [vmem:[#allocation8 + $0x6e0] sm:$0xff] }
 0x169   :  { %v2005_v12 = vpack.c.bf16 %v690_v3, %v686_v2  ;;  %v710_v46 = vld [vmem:[#allocation8 + $0x788] sm:$0xff]  ;;  %v709_v54 = vld [vmem:[#allocation8 + $0x780] sm:$0xff] }
 0x16a   :  { %1972 = vmatpush1.bf16.msra.mxu0 %v1971_v21  ;;  %2228 = vmatpush1.bf16.msra.mxu1 %v2227_v22  ;;  %v655_v21 = vld [vmem:[#allocation8 + $0x5d0] sm:$0xff]  ;;  %v714_v47 = vld [vmem:[#allocation8 + $0x7a8] sm:$0xff] }
 0x16b   :  { %1974 = vmatprep.subr.bf16.mxu0 %v1973_v25  ;;  %2230 = vmatprep.subr.bf16.mxu1 %v2229_v26  ;;  %v659_v22 = vld [vmem:[#allocation8 + $0x5f0] sm:$0xff]  ;;  %v664_v25 = vld [vmem:[#allocation8 + $0x618] sm:$0xff]  ;;  %v718_v60 = vld [vmem:[#allocation8 + $0x7c8] sm:$0xff] }
 0x16c   :  { %v668_v26 = vld [vmem:[#allocation8 + $0x638] sm:$0xff]  ;;  %v2247_v28 = vpack.c.bf16 %v659_v22, %v655_v21  ;;  %v2007_v21 = vpack.c.bf16 %v689_v11, %v685_v9  ;;  %v719_v11 = vld [vmem:[#allocation8 + $0x7d0] sm:$0xff] }
 0x16d   :  { %v2249_v32 = vpack.c.bf16 %v668_v26, %v664_v25  ;;  %v2009_v25 = vpack.c.bf16 %v698_v17, %v694_v16  ;;  %v732_v16 = vld [vmem:[#allocation8 + $0x838] sm:$0xff] }
 0x16e   :  { %1976 = vmatpush1.bf16.msra.mxu0 %v1975_v38  ;;  %2232 = vmatpush1.bf16.msra.mxu1 %v2231_v39  ;;  %v663_v38 = vld [vmem:[#allocation8 + $0x610] sm:$0xff] }
 0x16f   :  { %1978 = vmatprep.subr.bf16.mxu0 %v1977_v42  ;;  %2234 = vmatprep.subr.bf16.mxu1 %v2233_v43  ;;  %v667_v39 = vld [vmem:[#allocation8 + $0x630] sm:$0xff]  ;;  %v672_v42 = vld [vmem:[#allocation8 + $0x658] sm:$0xff] }
 0x170   :  { %v676_v43 = vld [vmem:[#allocation8 + $0x678] sm:$0xff]  ;;  %v2251_v45 = vpack.c.bf16 %v667_v39, %v663_v38  ;;  %v2011_v38 = vpack.c.bf16 %v697_v24, %v693_v23  ;;  %v729_v23 = vld [vmem:[#allocation8 + $0x820] sm:$0xff] }
 0x171   :  { %v2253_v49 = vpack.c.bf16 %v676_v43, %v672_v42  ;;  %v2013_v42 = vpack.c.bf16 %v706_v30, %v702_v29  ;;  %v738_v29 = vld [vmem:[#allocation8 + $0x868] sm:$0xff]  ;;  %v736_v30 = vld [vmem:[#allocation8 + $0x858] sm:$0xff] }
 0x172   :  { %1980 = vmatpush1.bf16.msra.mxu0 %v1979_v50  ;;  %2236 = vmatpush1.bf16.msra.mxu1 %v2235_v51  ;;  %v671_v50 = vld [vmem:[#allocation8 + $0x650] sm:$0xff] }
 0x173   :  { %1982 = vmatprep.subr.bf16.mxu0 %v1981_v55  ;;  %2238 = vmatprep.subr.bf16.mxu1 %v2237_v56  ;;  %v675_v51 = vld [vmem:[#allocation8 + $0x670] sm:$0xff]  ;;  %v680_v55 = vld [vmem:[#allocation8 + $0x698] sm:$0xff] }
 0x174   :  { %v684_v56 = vld [vmem:[#allocation8 + $0x6b8] sm:$0xff]  ;;  %v2255_v58 = vpack.c.bf16 %v675_v51, %v671_v50  ;;  %v143_v50 = vsub.s32 2, %v2836_v33  ;;  %v2015_v51 = vpack.c.bf16 %v705_v41, %v701_v40  ;;  %v737_v40 = vld [vmem:[#allocation8 + $0x860] sm:$0xff] }
 0x175   :  { %v2257_v63 = vpack.c.bf16 %v684_v56, %v680_v55  ;;  %v713_v55 = vld [vmem:[#allocation8 + $0x7a0] sm:$0xff]  ;;  %v2017_v56 = vpack.c.bf16 %v714_v47, %v710_v46  ;;  %v746_v46 = vld [vmem:[#allocation8 + $0x8a8] sm:$0xff]  ;;  %v744_v47 = vld [vmem:[#allocation8 + $0x898] sm:$0xff] }
 0x176   :  { %1984 = vmatpush1.bf16.msra.mxu0 %v1983_v0  ;;  %2240 = vmatpush1.bf16.msra.mxu1 %v2239_v1  ;;  %v679_v0 = vld [vmem:[#allocation8 + $0x690] sm:$0xff]  ;;  %v144_v2 = vrot.slane %v2839_v35, %v143_v50  ;;  %v2019_v3 = vpack.c.bf16 %v713_v55, %v709_v54  ;;  %v745_v54 = vld [vmem:[#allocation8 + $0x8a0] sm:$0xff] }
 0x177   :  { %1986 = vmatprep.subr.bf16.mxu0 %v1985_v5  ;;  %2242 = vmatprep.subr.bf16.mxu1 %v2241_v6  ;;  %v683_v1 = vld [vmem:[#allocation8 + $0x6b0] sm:$0xff]  ;;  %v688_v5 = vld [vmem:[#allocation8 + $0x6d8] sm:$0xff] }
 0x178   :  { %v692_v6 = vld [vmem:[#allocation8 + $0x6f8] sm:$0xff]  ;;  %v2259_v8 = vpack.c.bf16 %v683_v1, %v679_v0  ;;  %v155_v1 = vsub.s32 5, %v2836_v33 }
 0x179   :  { %v2261_v13 = vpack.c.bf16 %v692_v6, %v688_v5  ;;  %v724_v0 = vld [vmem:[#allocation8 + $0x7f8] sm:$0xff]  ;;  %v717_v6 = vld [vmem:[#allocation8 + $0x7c0] sm:$0xff] }
 0x17a   :  { %1988 = vmatpush1.bf16.msra.mxu0 %v1987_v14  ;;  %2244 = vmatpush1.bf16.msra.mxu1 %v2243_v15  ;;  %v687_v14 = vld [vmem:[#allocation8 + $0x6d0] sm:$0xff]  ;;  %v156_v17 = vrot.slane %v2839_v35, %v155_v1 }
 0x17b   :  { %1990 = vmatprep.subr.bf16.mxu0 %v1989_v19  ;;  %2246 = vmatprep.subr.bf16.mxu1 %v2245_v20  ;;  %v691_v15 = vld [vmem:[#allocation8 + $0x6f0] sm:$0xff]  ;;  %v696_v19 = vld [vmem:[#allocation8 + $0x718] sm:$0xff] }
 0x17c   :  { %v700_v20 = vld [vmem:[#allocation8 + $0x738] sm:$0xff]  ;;  %v2263_v22 = vpack.c.bf16 %v691_v15, %v687_v14  ;;  %v730_v14 = vld [vmem:[#allocation8 + $0x828] sm:$0xff]  ;;  %v388_v35 = vadd.f32 %v2856_v4, %v156_v17  ;;  %v761_v17 = vld [vmem:[#allocation8 + $0x920] sm:$0xff] }
 0x17d   :  { %v2265_v26 = vpack.c.bf16 %v700_v20, %v696_v19  ;;  %v728_v15 = vld [vmem:[#allocation8 + $0x818] sm:$0xff]  ;;  %v315_v19 = vadd.f32 %v2852_v53, %v144_v2  ;;  %v749_v2 = vld [vmem:[#allocation8 + $0x8c0] sm:$0xff] }
 0x17e   :  { %1992 = vmatpush1.bf16.msra.mxu0 %v1991_v27  ;;  %2248 = vmatpush1.bf16.msra.mxu1 %v2247_v28  ;;  %v695_v27 = vld [vmem:[#allocation8 + $0x710] sm:$0xff] }
 0x17f   :  { %1994 = vmatprep.subr.bf16.mxu0 %v1993_v31  ;;  %2250 = vmatprep.subr.bf16.mxu1 %v2249_v32  ;;  %v699_v28 = vld [vmem:[#allocation8 + $0x730] sm:$0xff]  ;;  %v704_v31 = vld [vmem:[#allocation8 + $0x758] sm:$0xff] }
 0x180   :  { %v708_v32 = vld [vmem:[#allocation8 + $0x778] sm:$0xff]  ;;  %v2267_v39 = vpack.c.bf16 %v699_v28, %v695_v27  ;;  %v731_v27 = vld [vmem:[#allocation8 + $0x830] sm:$0xff]  ;;  %v734_v28 = vld [vmem:[#allocation8 + $0x848] sm:$0xff] }
 0x181   :  { %v2269_v43 = vpack.c.bf16 %v708_v32, %v704_v31  ;;  %v740_v31 = vld [vmem:[#allocation8 + $0x878] sm:$0xff]  ;;  %v463_v32 = vmax.f32 %v315_v19, 0.0  ;;  %v2029_v41 = vpack.c.bf16 %v738_v29, %v734_v28  ;;  %v765_v29 = vld [vmem:[#allocation8 + $0x940] sm:$0xff] }
 0x182   :  { %1996 = vmatpush1.bf16.msra.mxu0 %v1995_v44  ;;  %2252 = vmatpush1.bf16.msra.mxu1 %v2251_v45  ;;  %v703_v44 = vld [vmem:[#allocation8 + $0x750] sm:$0xff] }
 0x183   :  { %1998 = vmatprep.subr.bf16.mxu0 %v1997_v48  ;;  %2254 = vmatprep.subr.bf16.mxu1 %v2253_v49  ;;  %v707_v45 = vld [vmem:[#allocation8 + $0x770] sm:$0xff]  ;;  %v712_v48 = vld [vmem:[#allocation8 + $0x798] sm:$0xff] }
 0x184   :  { %v716_v49 = vld [vmem:[#allocation8 + $0x7b8] sm:$0xff]  ;;  %v2271_v52 = vpack.c.bf16 %v707_v45, %v703_v44  ;;  %v739_v44 = vld [vmem:[#allocation8 + $0x870] sm:$0xff]  ;;  %v742_v45 = vld [vmem:[#allocation8 + $0x888] sm:$0xff] }
 0x185   :  { %v2033_v55 = vpack.c.bf16 %v746_v46, %v742_v45  ;;  %v777_v45 = vld [vmem:[#allocation8 + $0x9a0] sm:$0xff] }
 0x186   :  { %2000 = vmatpush1.bf16.msra.mxu0 %v1999_v57  ;;  %2256 = vmatpush1.bf16.msra.mxu1 %v2255_v58  ;;  %v2273_v57 = vpack.c.bf16 %v716_v49, %v712_v48  ;;  %v711_v58 = vld [vmem:[#allocation8 + $0x790] sm:$0xff]  ;;  %v748_v48 = vld [vmem:[#allocation8 + $0x8b8] sm:$0xff]  ;;  %v466_v49 = vmax.f32 %v388_v35, 0.0 }
 0x187   :  { %2002 = vmatprep.subr.bf16.mxu0 %v2001_v62  ;;  %2258 = vmatprep.subr.bf16.mxu1 %v2257_v63  ;;  %v722_v62 = vld [vmem:[#allocation8 + $0x7e8] sm:$0xff]  ;;  %v720_v63 = vld [vmem:[#allocation8 + $0x7d8] sm:$0xff]  ;;  %v2275_v5 = vpack.c.bf16 %v715_v59, %v711_v58  ;;  %v747_v58 = vld [vmem:[#allocation8 + $0x8b0] sm:$0xff] }
 0x188   :  { %v2277_v9 = vpack.c.bf16 %v724_v0, %v720_v63  ;;  %v750_v59 = vld [vmem:[#allocation8 + $0x8c8] sm:$0xff]  ;;  %v756_v63 = vld [vmem:[#allocation8 + $0x8f8] sm:$0xff] }
 0x18a   :  { %2004 = vmatpush1.bf16.msra.mxu0 %v2003_v7  ;;  %2260 = vmatpush1.bf16.msra.mxu1 %v2259_v8  ;;  %v721_v7 = vld [vmem:[#allocation8 + $0x7e0] sm:$0xff]  ;;  %v2021_v8 = vpack.c.bf16 %v722_v62, %v718_v60  ;;  %v754_v60 = vld [vmem:[#allocation8 + $0x8e8] sm:$0xff]  ;;  %v752_v62 = vld [vmem:[#allocation8 + $0x8d8] sm:$0xff] }
 0x18b   :  { %2006 = vmatprep.subr.bf16.mxu0 %v2005_v12  ;;  %2262 = vmatprep.subr.bf16.mxu1 %v2261_v13  ;;  %v723_v12 = vld [vmem:[#allocation8 + $0x7f0] sm:$0xff]  ;;  %v726_v13 = vld [vmem:[#allocation8 + $0x808] sm:$0xff]  ;;  %v2023_v20 = vpack.c.bf16 %v721_v7, %v717_v6  ;;  %v2293_v6 = vpack.c.bf16 %v756_v63, %v752_v62 }
 0x18c   :  { %v2025_v24 = vpack.c.bf16 %v730_v14, %v726_v13  ;;  %v751_v7 = vld [vmem:[#allocation8 + $0x8d0] sm:$0xff]  ;;  %v764_v13 = vld [vmem:[#allocation8 + $0x938] sm:$0xff] }
 0x18d   :  { %v783_v62 = vld [vmem:[#allocation8 + $0x9d0] sm:$0xff] }
 0x18e   :  { %2008 = vmatpush1.bf16.msra.mxu0 %v2007_v21  ;;  %2264 = vmatpush1.bf16.msra.mxu1 %v2263_v22  ;;  %v2279_v21 = vpack.c.bf16 %v723_v12, %v719_v11  ;;  %v725_v22 = vld [vmem:[#allocation8 + $0x800] sm:$0xff]  ;;  %v762_v11 = vld [vmem:[#allocation8 + $0x928] sm:$0xff]  ;;  %v760_v12 = vld [vmem:[#allocation8 + $0x918] sm:$0xff] }
 0x18f   :  { %2010 = vmatprep.subr.bf16.mxu0 %v2009_v25  ;;  %2266 = vmatprep.subr.bf16.mxu1 %v2265_v26  ;;  %v2281_v25 = vpack.c.bf16 %v732_v16, %v728_v15  ;;  %v727_v26 = vld [vmem:[#allocation8 + $0x810] sm:$0xff]  ;;  %v2027_v53 = vpack.c.bf16 %v729_v23, %v725_v22  ;;  %v757_v16 = vld [vmem:[#allocation8 + $0x900] sm:$0xff]  ;;  %v766_v23 = vld [vmem:[#allocation8 + $0x948] sm:$0xff] }
 0x190   :  { %v763_v22 = vld [vmem:[#allocation8 + $0x930] sm:$0xff] }
 0x191   :  { %v787_v63 = vld [vmem:[#allocation8 + $0x9f0] sm:$0xff] }
 0x192   :  { %2012 = vmatpush1.bf16.msra.mxu0 %v2011_v38  ;;  %2268 = vmatpush1.bf16.msra.mxu1 %v2267_v39  ;;  %v2283_v38 = vpack.c.bf16 %v731_v27, %v727_v26  ;;  %v733_v39 = vld [vmem:[#allocation8 + $0x840] sm:$0xff]  ;;  %v772_v26 = vld [vmem:[#allocation8 + $0x978] sm:$0xff]  ;;  %v2043_v27 = vpack.c.bf16 %v761_v17, %v757_v16 }
 0x193   :  { %2014 = vmatprep.subr.bf16.mxu0 %v2013_v42  ;;  %2270 = vmatprep.subr.bf16.mxu1 %v2269_v43  ;;  %v2285_v42 = vpack.c.bf16 %v740_v31, %v736_v30  ;;  %v735_v43 = vld [vmem:[#allocation8 + $0x850] sm:$0xff]  ;;  %v2031_v4 = vpack.c.bf16 %v737_v40, %v733_v39  ;;  %v769_v30 = vld [vmem:[#allocation8 + $0x960] sm:$0xff]  ;;  %v778_v39 = vld [vmem:[#allocation8 + $0x9a8] sm:$0xff] }
 0x194   :  { %v776_v40 = vld [vmem:[#allocation8 + $0x998] sm:$0xff] }
 0x195   :  { %v800_v16 = vld [vmem:[#allocation8 + $0xa58] sm:$0xff] }
 0x196   :  { %2016 = vmatpush1.bf16.msra.mxu0 %v2015_v51  ;;  %2272 = vmatpush1.bf16.msra.mxu1 %v2271_v52  ;;  %v2287_v51 = vpack.c.bf16 %v739_v44, %v735_v43  ;;  %v741_v52 = vld [vmem:[#allocation8 + $0x880] sm:$0xff]  ;;  %v804_v17 = vld [vmem:[#allocation8 + $0xa78] sm:$0xff] }
 0x197   :  { %2018 = vmatprep.subr.bf16.mxu0 %v2017_v56  ;;  %2274 = vmatprep.subr.bf16.mxu1 %v2273_v57  ;;  %v2289_v56 = vpack.c.bf16 %v748_v48, %v744_v47  ;;  %v743_v57 = vld [vmem:[#allocation8 + $0x890] sm:$0xff]  ;;  %v2035_v0 = vpack.c.bf16 %v745_v54, %v741_v52  ;;  %v773_v44 = vld [vmem:[#allocation8 + $0x980] sm:$0xff]  ;;  %v784_v52 = vld [vmem:[#allocation8 + $0x9d8] sm:$0xff] }
 0x198   :  { %v2291_v1 = vpack.c.bf16 %v747_v58, %v743_v57  ;;  %v775_v48 = vld [vmem:[#allocation8 + $0x990] sm:$0xff]  ;;  %v788_v54 = vld [vmem:[#allocation8 + $0x9f8] sm:$0xff]  ;;  %v781_v57 = vld [vmem:[#allocation8 + $0x9c0] sm:$0xff] }
 0x199   :  { %v785_v58 = vld [vmem:[#allocation8 + $0x9e0] sm:$0xff] }
 0x19a   :  { %2020 = vmatpush1.bf16.msra.mxu0 %v2019_v3  ;;  %2276 = vmatpush1.bf16.msra.mxu1 %v2275_v5  ;;  %v753_v3 = vld [vmem:[#allocation8 + $0x8e0] sm:$0xff]  ;;  %v2037_v5 = vpack.c.bf16 %v754_v60, %v750_v59  ;;  %v2309_v60 = vpack.c.bf16 %v788_v54, %v784_v52  ;;  %v815_v52 = vld [vmem:[#allocation8 + $0xad0] sm:$0xff] }
 0x19b   :  { %2022 = vmatprep.subr.bf16.mxu0 %v2021_v8  ;;  %2278 = vmatprep.subr.bf16.mxu1 %v2277_v9  ;;  %v755_v8 = vld [vmem:[#allocation8 + $0x8f0] sm:$0xff]  ;;  %v758_v9 = vld [vmem:[#allocation8 + $0x908] sm:$0xff]  ;;  %v2039_v14 = vpack.c.bf16 %v753_v3, %v749_v2  ;;  %v792_v2 = vld [vmem:[#allocation8 + $0xa18] sm:$0xff] }
 0x19c   :  { %v2295_v15 = vpack.c.bf16 %v755_v8, %v751_v7  ;;  %v2041_v19 = vpack.c.bf16 %v762_v11, %v758_v9  ;;  %v796_v3 = vld [vmem:[#allocation8 + $0xa38] sm:$0xff]  ;;  %v789_v7 = vld [vmem:[#allocation8 + $0xa00] sm:$0xff]  ;;  %v819_v54 = vld [vmem:[#allocation8 + $0xaf0] sm:$0xff] }
 0x19d   :  { %v793_v8 = vld [vmem:[#allocation8 + $0xa20] sm:$0xff]  ;;  %v2313_v11 = vpack.c.bf16 %v796_v3, %v792_v2  ;;  %v823_v2 = vld [vmem:[#allocation8 + $0xb10] sm:$0xff] }
 0x19e   :  { %2024 = vmatpush1.bf16.msra.mxu0 %v2023_v20  ;;  %2280 = vmatpush1.bf16.msra.mxu1 %v2279_v21  ;;  %v2297_v20 = vpack.c.bf16 %v764_v13, %v760_v12  ;;  %v759_v21 = vld [vmem:[#allocation8 + $0x910] sm:$0xff] }
 0x19f   :  { %2026 = vmatprep.subr.bf16.mxu0 %v2025_v24  ;;  %2282 = vmatprep.subr.bf16.mxu1 %v2281_v25  ;;  %v770_v24 = vld [vmem:[#allocation8 + $0x968] sm:$0xff]  ;;  %v768_v25 = vld [vmem:[#allocation8 + $0x958] sm:$0xff]  ;;  %v2299_v28 = vpack.c.bf16 %v763_v22, %v759_v21  ;;  %v791_v12 = vld [vmem:[#allocation8 + $0xa10] sm:$0xff] }
 0x1a0   :  { %v2045_v31 = vpack.c.bf16 %v770_v24, %v766_v23  ;;  %v2301_v35 = vpack.c.bf16 %v772_v26, %v768_v25  ;;  %v795_v13 = vld [vmem:[#allocation8 + $0xa30] sm:$0xff]  ;;  %v797_v21 = vld [vmem:[#allocation8 + $0xa40] sm:$0xff]  ;;  %v2317_v24 = vpack.c.bf16 %v804_v17, %v800_v16 }
 0x1a1   :  { %1139 = vmatmul.mubr.f32.vlgmr.msra.gmra.mrb[4].mxu0 %v463_v32  ;;  %1423 = vmatmul.mubr.f32.vlgmr.msra.gmra.mrb[4].mxu1 %v463_v32  ;;  %v767_v32 = vld [vmem:[#allocation8 + $0x950] sm:$0xff]  ;;  %v801_v22 = vld [vmem:[#allocation8 + $0xa60] sm:$0xff] }
 0x1a2   :  { %2028 = vmatpush1.bf16.msra.mxu0 %v2027_v53  ;;  %2284 = vmatpush1.bf16.msra.mxu1 %v2283_v38  ;;  %v771_v53 = vld [vmem:[#allocation8 + $0x970] sm:$0xff]  ;;  %v774_v38 = vld [vmem:[#allocation8 + $0x988] sm:$0xff] }
 0x1a3   :  { %2030 = vmatprep.subr.bf16.mxu0 %v2029_v41  ;;  %2286 = vmatprep.subr.bf16.mxu1 %v2285_v42  ;;  %v780_v41 = vld [vmem:[#allocation8 + $0x9b8] sm:$0xff]  ;;  %v2047_v42 = vpack.c.bf16 %v769_v30, %v765_v29  ;;  %v2303_v43 = vpack.c.bf16 %v771_v53, %v767_v32  ;;  %v2049_v46 = vpack.c.bf16 %v778_v39, %v774_v38  ;;  %v799_v25 = vld [vmem:[#allocation8 + $0xa50] sm:$0xff]  ;;  %v805_v32 = vld [vmem:[#allocation8 + $0xa80] sm:$0xff] }
 0x1a4   :  { %1209 = vmatprep.mubr.f32.mxu0 %v466_v49  ;;  %1493 = vmatprep.mubr.f32.mxu1 %v466_v49  ;;  %v2305_v47 = vpack.c.bf16 %v780_v41, %v776_v40  ;;  %v779_v49 = vld [vmem:[#allocation8 + $0x9b0] sm:$0xff]  ;;  %v808_v29 = vld [vmem:[#allocation8 + $0xa98] sm:$0xff]  ;;  %v809_v53 = vld [vmem:[#allocation8 + $0xaa0] sm:$0xff] }
 0x1a5   :  { %v803_v26 = vld [vmem:[#allocation8 + $0xa70] sm:$0xff]  ;;  %v812_v30 = vld [vmem:[#allocation8 + $0xab8] sm:$0xff] }
 0x1a6   :  { %2032 = vmatpush1.bf16.msra.mxu0 %v2031_v4  ;;  %2288 = vmatpush1.bf16.msra.mxu1 %v2287_v51  ;;  %v782_v4 = vld [vmem:[#allocation8 + $0x9c8] sm:$0xff]  ;;  %v2321_v39 = vpack.c.bf16 %v812_v30, %v808_v29  ;;  %v807_v40 = vld [vmem:[#allocation8 + $0xa90] sm:$0xff] }
 0x1a7   :  { %2034 = vmatprep.subr.bf16.mxu0 %v2033_v55  ;;  %2290 = vmatprep.subr.bf16.mxu1 %v2289_v56  ;;  %v786_v51 = vld [vmem:[#allocation8 + $0x9e8] sm:$0xff]  ;;  %v2051_v55 = vpack.c.bf16 %v777_v45, %v773_v44  ;;  %v2307_v56 = vpack.c.bf16 %v779_v49, %v775_v48  ;;  %v811_v41 = vld [vmem:[#allocation8 + $0xab0] sm:$0xff]  ;;  %v816_v44 = vld [vmem:[#allocation8 + $0xad8] sm:$0xff] }
 0x1a8   :  { %v2053_v59 = vpack.c.bf16 %v786_v51, %v782_v4  ;;  %v820_v45 = vld [vmem:[#allocation8 + $0xaf8] sm:$0xff]  ;;  %v813_v48 = vld [vmem:[#allocation8 + $0xac0] sm:$0xff]  ;;  %v827_v3 = vld [vmem:[#allocation8 + $0xb30] sm:$0xff] }
 0x1a9   :  { %v817_v49 = vld [vmem:[#allocation8 + $0xae0] sm:$0xff]  ;;  %v2325_v51 = vpack.c.bf16 %v820_v45, %v816_v44  ;;  %v831_v16 = vld [vmem:[#allocation8 + $0xb50] sm:$0xff] }
 0x1aa   :  { %2036 = vmatpush1.bf16.msra.mxu0 %v2035_v0  ;;  %2292 = vmatpush1.bf16.msra.mxu1 %v2291_v1  ;;  %v790_v0 = vld [vmem:[#allocation8 + $0xa08] sm:$0xff]  ;;  %v835_v17 = vld [vmem:[#allocation8 + $0xb70] sm:$0xff]  ;;  %v845_v44 = vld [vmem:[#allocation8 + $0xbc0] sm:$0xff] }
 0x1ab   :  { %2038 = vmatprep.subr.bf16.mxu0 %v2037_v5  ;;  %2294 = vmatprep.subr.bf16.mxu1 %v2293_v6  ;;  %v794_v1 = vld [vmem:[#allocation8 + $0xa28] sm:$0xff]  ;;  %v2055_v5 = vpack.c.bf16 %v785_v58, %v781_v57  ;;  %v2311_v6 = vpack.c.bf16 %v787_v63, %v783_v62  ;;  %v824_v57 = vld [vmem:[#allocation8 + $0xb18] sm:$0xff]  ;;  %v821_v62 = vld [vmem:[#allocation8 + $0xb00] sm:$0xff] }
 0x1ac   :  { %v2057_v9 = vpack.c.bf16 %v794_v1, %v790_v0  ;;  %v828_v58 = vld [vmem:[#allocation8 + $0xb38] sm:$0xff]  ;;  %v825_v63 = vld [vmem:[#allocation8 + $0xb20] sm:$0xff]  ;;  %v839_v30 = vld [vmem:[#allocation8 + $0xb90] sm:$0xff] }
 0x1ad   :  { %v2329_v1 = vpack.c.bf16 %v828_v58, %v824_v57  ;;  %v849_v45 = vld [vmem:[#allocation8 + $0xbe0] sm:$0xff] }
 0x1ae   :  { %2040 = vmatpush1.bf16.msra.mxu0 %v2039_v14  ;;  %2296 = vmatpush1.bf16.msra.mxu1 %v2295_v15  ;;  %v798_v14 = vld [vmem:[#allocation8 + $0xa48] sm:$0xff]  ;;  %v2087_v57 = vpack.c.bf16 %v849_v45, %v845_v44  ;;  %v879_v44 = vld [vmem:[#allocation8 + $0xcd0] sm:$0xff] }
 0x1af   :  { %2042 = vmatprep.subr.bf16.mxu0 %v2041_v19  ;;  %2298 = vmatprep.subr.bf16.mxu1 %v2297_v20  ;;  %v802_v15 = vld [vmem:[#allocation8 + $0xa68] sm:$0xff]  ;;  %v2059_v19 = vpack.c.bf16 %v793_v8, %v789_v7  ;;  %v2315_v20 = vpack.c.bf16 %v795_v13, %v791_v12  ;;  %v832_v7 = vld [vmem:[#allocation8 + $0xb58] sm:$0xff]  ;;  %v829_v12 = vld [vmem:[#allocation8 + $0xb40] sm:$0xff] }
 0x1b0   :  { %v2061_v23 = vpack.c.bf16 %v802_v15, %v798_v14  ;;  %v836_v8 = vld [vmem:[#allocation8 + $0xb78] sm:$0xff]  ;;  %v833_v13 = vld [vmem:[#allocation8 + $0xb60] sm:$0xff]  ;;  %v883_v45 = vld [vmem:[#allocation8 + $0xcf0] sm:$0xff] }
 0x1b1   :  { %v2333_v15 = vpack.c.bf16 %v836_v8, %v832_v7 }
 0x1b2   :  { %2044 = vmatpush1.bf16.msra.mxu0 %v2043_v27  ;;  %2300 = vmatpush1.bf16.msra.mxu1 %v2299_v28  ;;  %v806_v27 = vld [vmem:[#allocation8 + $0xa88] sm:$0xff] }
 0x1b3   :  { %2046 = vmatprep.subr.bf16.mxu0 %v2045_v31  ;;  %2302 = vmatprep.subr.bf16.mxu1 %v2301_v35  ;;  %v810_v28 = vld [vmem:[#allocation8 + $0xaa8] sm:$0xff]  ;;  %v2063_v31 = vpack.c.bf16 %v801_v22, %v797_v21  ;;  %v2319_v35 = vpack.c.bf16 %v803_v26, %v799_v25  ;;  %v840_v21 = vld [vmem:[#allocation8 + $0xb98] sm:$0xff]  ;;  %v2335_v25 = vpack.c.bf16 %v835_v17, %v831_v16  ;;  %v837_v26 = vld [vmem:[#allocation8 + $0xb80] sm:$0xff] }
 0x1b4   :  { %v2065_v38 = vpack.c.bf16 %v810_v28, %v806_v27  ;;  %v844_v22 = vld [vmem:[#allocation8 + $0xbb8] sm:$0xff]  ;;  %v841_v27 = vld [vmem:[#allocation8 + $0xba0] sm:$0xff]  ;;  %v867_v16 = vld [vmem:[#allocation8 + $0xc70] sm:$0xff] }
 0x1b5   :  { %v2337_v29 = vpack.c.bf16 %v844_v22, %v840_v21  ;;  %v870_v17 = vld [vmem:[#allocation8 + $0xc88] sm:$0xff]  ;;  %v876_v21 = vld [vmem:[#allocation8 + $0xcb8] sm:$0xff] }
 0x1b6   :  { %2048 = vmatpush1.bf16.msra.mxu0 %v2047_v42  ;;  %2304 = vmatpush1.bf16.msra.mxu1 %v2303_v43  ;;  %v814_v42 = vld [vmem:[#allocation8 + $0xac8] sm:$0xff] }
 0x1b7   :  { %2050 = vmatprep.subr.bf16.mxu0 %v2049_v46  ;;  %2306 = vmatprep.subr.bf16.mxu1 %v2305_v47  ;;  %v818_v43 = vld [vmem:[#allocation8 + $0xae8] sm:$0xff]  ;;  %v2067_v46 = vpack.c.bf16 %v809_v53, %v805_v32  ;;  %v2323_v47 = vpack.c.bf16 %v811_v41, %v807_v40  ;;  %v848_v53 = vld [vmem:[#allocation8 + $0xbd8] sm:$0xff] }
 0x1b8   :  { %v2069_v4 = vpack.c.bf16 %v818_v43, %v814_v42  ;;  %v850_v32 = vld [vmem:[#allocation8 + $0xbe8] sm:$0xff]  ;;  %v2872_v40 = vld [vmem:[#allocation7] sm:$0xff]  ;;  %v2083_v42 = vpack.c.bf16 %v841_v27, %v837_v26 }
 0x1ba   :  { %2052 = vmatpush1.bf16.msra.mxu0 %v2051_v55  ;;  %2308 = vmatpush1.bf16.msra.mxu1 %v2307_v56  ;;  %v822_v55 = vld [vmem:[#allocation8 + $0xb08] sm:$0xff] }
 0x1bb   :  { %2054 = vmatprep.subr.bf16.mxu0 %v2053_v59  ;;  %2310 = vmatprep.subr.bf16.mxu1 %v2309_v60  ;;  %v826_v56 = vld [vmem:[#allocation8 + $0xb28] sm:$0xff]  ;;  %v2071_v59 = vpack.c.bf16 %v817_v49, %v813_v48  ;;  %v2327_v60 = vpack.c.bf16 %v819_v54, %v815_v52  ;;  %v847_v48 = vld [vmem:[#allocation8 + $0xbd0] sm:$0xff]  ;;  %v856_v52 = vld [vmem:[#allocation8 + $0xc18] sm:$0xff] }
 0x1bc   :  { %v2073_v0 = vpack.c.bf16 %v826_v56, %v822_v55  ;;  %v851_v49 = vld [vmem:[#allocation8 + $0xbf0] sm:$0xff]  ;;  %v860_v54 = vld [vmem:[#allocation8 + $0xc38] sm:$0xff] }
 0x1bd   :  { %v2343_v58 = vpack.c.bf16 %v851_v49, %v847_v48  ;;  %v888_v48 = vld [vmem:[#allocation8 + $0xd18] sm:$0xff] }
 0x1be   :  { %2056 = vmatpush1.bf16.msra.mxu0 %v2055_v5  ;;  %2312 = vmatpush1.bf16.msra.mxu1 %v2311_v6  ;;  %v830_v5 = vld [vmem:[#allocation8 + $0xb48] sm:$0xff]  ;;  %v892_v49 = vld [vmem:[#allocation8 + $0xd38] sm:$0xff] }
 0x1bf   :  { %2058 = vmatprep.subr.bf16.mxu0 %v2057_v9  ;;  %2314 = vmatprep.subr.bf16.mxu1 %v2313_v11  ;;  %v834_v6 = vld [vmem:[#allocation8 + $0xb68] sm:$0xff]  ;;  %v2075_v9 = vpack.c.bf16 %v825_v63, %v821_v62  ;;  %v2331_v11 = vpack.c.bf16 %v827_v3, %v823_v2  ;;  %v2345_v63 = vpack.c.bf16 %v860_v54, %v856_v52  ;;  %v885_v52 = vld [vmem:[#allocation8 + $0xd00] sm:$0xff] }
 0x1c0   :  { %v2077_v14 = vpack.c.bf16 %v834_v6, %v830_v5  ;;  %v862_v2 = vld [vmem:[#allocation8 + $0xc48] sm:$0xff]  ;;  %v864_v5 = vld [vmem:[#allocation8 + $0xc58] sm:$0xff]  ;;  %v889_v54 = vld [vmem:[#allocation8 + $0xd20] sm:$0xff] }
 0x1c1   :  { %v866_v3 = vld [vmem:[#allocation8 + $0xc68] sm:$0xff]  ;;  %v868_v6 = vld [vmem:[#allocation8 + $0xc78] sm:$0xff] }
 0x1c2   :  { %2060 = vmatpush1.bf16.msra.mxu0 %v2059_v19  ;;  %2316 = vmatpush1.bf16.msra.mxu1 %v2315_v20  ;;  %v838_v19 = vld [vmem:[#allocation8 + $0xb88] sm:$0xff] }
 0x1c3   :  { %2062 = vmatprep.subr.bf16.mxu0 %v2061_v23  ;;  %2318 = vmatprep.subr.bf16.mxu1 %v2317_v24  ;;  %v842_v20 = vld [vmem:[#allocation8 + $0xba8] sm:$0xff]  ;;  %v151_v23 = vsub.s32 4, %v2836_v33  ;;  %v2079_v24 = vpack.c.bf16 %v833_v13, %v829_v12  ;;  %v865_v12 = vld [vmem:[#allocation8 + $0xc60] sm:$0xff]  ;;  %v2093_v13 = vpack.c.bf16 %v866_v3, %v862_v2 }
 0x1c4   :  { %v2081_v28 = vpack.c.bf16 %v842_v20, %v838_v19  ;;  %v874_v19 = vld [vmem:[#allocation8 + $0xca8] sm:$0xff]  ;;  %v872_v20 = vld [vmem:[#allocation8 + $0xc98] sm:$0xff]  ;;  %v893_v2 = vld [vmem:[#allocation8 + $0xd40] sm:$0xff] }
 0x1c5   :  { %v152_v41 = vrot.slane %v2872_v40, %v151_v23  ;;  %v2097_v26 = vpack.c.bf16 %v874_v19, %v870_v17  ;;  %v2353_v27 = vpack.c.bf16 %v876_v21, %v872_v20  ;;  %v897_v3 = vld [vmem:[#allocation8 + $0xd60] sm:$0xff]  ;;  %v903_v20 = vld [vmem:[#allocation8 + $0xd90] sm:$0xff] }
 0x1c6   :  { %2064 = vmatpush1.bf16.msra.mxu0 %v2063_v31  ;;  %2320 = vmatpush1.bf16.msra.mxu1 %v2319_v35  ;;  %v843_v31 = vld [vmem:[#allocation8 + $0xbb0] sm:$0xff]  ;;  %v846_v35 = vld [vmem:[#allocation8 + $0xbc8] sm:$0xff] }
 0x1c7   :  { %2066 = vmatprep.subr.bf16.mxu0 %v2065_v38  ;;  %2322 = vmatprep.subr.bf16.mxu1 %v2321_v39  ;;  %v852_v38 = vld [vmem:[#allocation8 + $0xbf8] sm:$0xff]  ;;  %v163_v39 = vsub.s32 7, %v2836_v33  ;;  %v2339_v43 = vpack.c.bf16 %v843_v31, %v839_v30  ;;  %v386_v56 = vadd.f32 %v2854_v61, %v152_v41  ;;  %v878_v30 = vld [vmem:[#allocation8 + $0xcc8] sm:$0xff]  ;;  %v881_v41 = vld [vmem:[#allocation8 + $0xce0] sm:$0xff] }
 0x1c8   :  { %v882_v31 = vld [vmem:[#allocation8 + $0xce8] sm:$0xff]  ;;  %v907_v21 = vld [vmem:[#allocation8 + $0xdb0] sm:$0xff] }
 0x1c9   :  { %v164_v55 = vrot.slane %v2872_v40, %v163_v39  ;;  %v465_v8 = vmax.f32 %v386_v56, 0.0  ;;  %v877_v39 = vld [vmem:[#allocation8 + $0xcc0] sm:$0xff]  ;;  %v2361_v56 = vpack.c.bf16 %v892_v49, %v888_v48  ;;  %v923_v48 = vld [vmem:[#allocation8 + $0xe30] sm:$0xff]  ;;  %v926_v49 = vld [vmem:[#allocation8 + $0xe48] sm:$0xff] }
 0x1ca   :  { %2068 = vmatpush1.bf16.msra.mxu0 %v2067_v46  ;;  %2324 = vmatpush1.bf16.msra.mxu1 %v2323_v47  ;;  %v2085_v46 = vpack.c.bf16 %v850_v32, %v846_v35  ;;  %v2341_v47 = vpack.c.bf16 %v852_v38, %v848_v53  ;;  %v880_v35 = vld [vmem:[#allocation8 + $0xcd8] sm:$0xff] }
 0x1cb   :  { %2070 = vmatprep.subr.bf16.mxu0 %v2069_v4  ;;  %2326 = vmatprep.subr.bf16.mxu1 %v2325_v51  ;;  %v854_v4 = vld [vmem:[#allocation8 + $0xc08] sm:$0xff]  ;;  %v459_v7 = vadd.f32 %v2860_v18, %v164_v55  ;;  %v884_v32 = vld [vmem:[#allocation8 + $0xcf8] sm:$0xff] }
 0x1cc   :  { %v858_v51 = vld [vmem:[#allocation8 + $0xc28] sm:$0xff] }
 0x1cd   :  { %v2089_v62 = vpack.c.bf16 %v858_v51, %v854_v4  ;;  %v468_v22 = vmax.f32 %v459_v7, 0.0  ;;  %v2103_v4 = vpack.c.bf16 %v881_v41, %v877_v39  ;;  %v2359_v51 = vpack.c.bf16 %v883_v45, %v879_v44  ;;  %v895_v7 = vld [vmem:[#allocation8 + $0xd50] sm:$0xff]  ;;  %v924_v39 = vld [vmem:[#allocation8 + $0xe38] sm:$0xff]  ;;  %v921_v44 = vld [vmem:[#allocation8 + $0xe20] sm:$0xff] }
 0x1ce   :  { %2072 = vmatpush1.bf16.msra.mxu0 %v2071_v59  ;;  %2328 = vmatpush1.bf16.msra.mxu1 %v2327_v60  ;;  %v853_v59 = vld [vmem:[#allocation8 + $0xc00] sm:$0xff] }
 0x1cf   :  { %2074 = vmatprep.subr.bf16.mxu0 %v2073_v0  ;;  %2330 = vmatprep.subr.bf16.mxu1 %v2329_v1  ;;  %v857_v60 = vld [vmem:[#allocation8 + $0xc20] sm:$0xff]  ;;  %v855_v0 = vld [vmem:[#allocation8 + $0xc10] sm:$0xff] }
 0x1d0   :  { %v859_v1 = vld [vmem:[#allocation8 + $0xc30] sm:$0xff]  ;;  %v2091_v61 = vpack.c.bf16 %v857_v60, %v853_v59  ;;  %v894_v59 = vld [vmem:[#allocation8 + $0xd48] sm:$0xff] }
 0x1d1   :  { %v898_v60 = vld [vmem:[#allocation8 + $0xd68] sm:$0xff] }
 0x1d2   :  { %2076 = vmatpush1.bf16.msra.mxu0 %v2075_v9  ;;  %2332 = vmatpush1.bf16.msra.mxu1 %v2331_v11  ;;  %v2347_v9 = vpack.c.bf16 %v859_v1, %v855_v0  ;;  %v861_v11 = vld [vmem:[#allocation8 + $0xc40] sm:$0xff]  ;;  %v2107_v0 = vpack.c.bf16 %v889_v54, %v885_v52  ;;  %v932_v52 = vld [vmem:[#allocation8 + $0xe78] sm:$0xff] }
 0x1d3   :  { %2078 = vmatprep.subr.bf16.mxu0 %v2077_v14  ;;  %2334 = vmatprep.subr.bf16.mxu1 %v2333_v15  ;;  %v2349_v14 = vpack.c.bf16 %v868_v6, %v864_v5  ;;  %v863_v15 = vld [vmem:[#allocation8 + $0xc50] sm:$0xff]  ;;  %v2095_v18 = vpack.c.bf16 %v865_v12, %v861_v11  ;;  %v2109_v5 = vpack.c.bf16 %v898_v60, %v894_v59  ;;  %v904_v11 = vld [vmem:[#allocation8 + $0xd98] sm:$0xff] }
 0x1d4   :  { %v2351_v23 = vpack.c.bf16 %v867_v16, %v863_v15  ;;  %v908_v12 = vld [vmem:[#allocation8 + $0xdb8] sm:$0xff]  ;;  %v901_v15 = vld [vmem:[#allocation8 + $0xd80] sm:$0xff]  ;;  %v927_v60 = vld [vmem:[#allocation8 + $0xe50] sm:$0xff] }
 0x1d5   :  { %v905_v16 = vld [vmem:[#allocation8 + $0xda0] sm:$0xff]  ;;  %v2369_v19 = vpack.c.bf16 %v908_v12, %v904_v11  ;;  %v939_v11 = vld [vmem:[#allocation8 + $0xeb0] sm:$0xff]  ;;  %v942_v12 = vld [vmem:[#allocation8 + $0xec8] sm:$0xff] }
 0x1d6   :  { %2080 = vmatpush1.bf16.msra.mxu0 %v2079_v24  ;;  %2336 = vmatpush1.bf16.msra.mxu1 %v2335_v25  ;;  %v869_v24 = vld [vmem:[#allocation8 + $0xc80] sm:$0xff] }
 0x1d7   :  { %2082 = vmatprep.subr.bf16.mxu0 %v2081_v28  ;;  %2338 = vmatprep.subr.bf16.mxu1 %v2337_v29  ;;  %v873_v25 = vld [vmem:[#allocation8 + $0xca0] sm:$0xff]  ;;  %v871_v28 = vld [vmem:[#allocation8 + $0xc90] sm:$0xff] }
 0x1d8   :  { %v875_v29 = vld [vmem:[#allocation8 + $0xcb0] sm:$0xff]  ;;  %v2099_v53 = vpack.c.bf16 %v873_v25, %v869_v24  ;;  %v916_v24 = vld [vmem:[#allocation8 + $0xdf8] sm:$0xff]  ;;  %v2115_v25 = vpack.c.bf16 %v905_v16, %v901_v15 }
 0x1d9   :  { %v2355_v38 = vpack.c.bf16 %v875_v29, %v871_v28  ;;  %v913_v28 = vld [vmem:[#allocation8 + $0xde0] sm:$0xff]  ;;  %v948_v15 = vld [vmem:[#allocation8 + $0xef8] sm:$0xff] }
 0x1da   :  { %2084 = vmatpush1.bf16.msra.mxu0 %v2083_v42  ;;  %2340 = vmatpush1.bf16.msra.mxu1 %v2339_v43  ;;  %v2101_v42 = vpack.c.bf16 %v882_v31, %v878_v30  ;;  %v2357_v43 = vpack.c.bf16 %v884_v32, %v880_v35  ;;  %v911_v31 = vld [vmem:[#allocation8 + $0xdd0] sm:$0xff]  ;;  %v918_v32 = vld [vmem:[#allocation8 + $0xe08] sm:$0xff] }
 0x1db   :  { %2086 = vmatprep.subr.bf16.mxu0 %v2085_v46  ;;  %2342 = vmatprep.subr.bf16.mxu1 %v2341_v47  ;;  %v886_v46 = vld [vmem:[#allocation8 + $0xd08] sm:$0xff]  ;;  %v915_v35 = vld [vmem:[#allocation8 + $0xdf0] sm:$0xff] }
 0x1dc   :  { %v890_v47 = vld [vmem:[#allocation8 + $0xd28] sm:$0xff] }
 0x1dd   :  { %v2105_v55 = vpack.c.bf16 %v890_v47, %v886_v46  ;;  %v919_v47 = vld [vmem:[#allocation8 + $0xe10] sm:$0xff] }
 0x1de   :  { %2088 = vmatpush1.bf16.msra.mxu0 %v2087_v57  ;;  %2344 = vmatpush1.bf16.msra.mxu1 %v2343_v58  ;;  %v887_v57 = vld [vmem:[#allocation8 + $0xd10] sm:$0xff] }
 0x1df   :  { %2090 = vmatprep.subr.bf16.mxu0 %v2089_v62  ;;  %2346 = vmatprep.subr.bf16.mxu1 %v2345_v63  ;;  %v891_v58 = vld [vmem:[#allocation8 + $0xd30] sm:$0xff]  ;;  %v896_v62 = vld [vmem:[#allocation8 + $0xd58] sm:$0xff] }
 0x1e0   :  { %v900_v63 = vld [vmem:[#allocation8 + $0xd78] sm:$0xff]  ;;  %v2363_v1 = vpack.c.bf16 %v891_v58, %v887_v57  ;;  %v929_v57 = vld [vmem:[#allocation8 + $0xe60] sm:$0xff] }
 0x1e1   :  { %1210 = vmatmul.mubr.f32.vlgmr.msra.gmra.mrb[4].mxu0 %v465_v8  ;;  %1494 = vmatmul.mubr.f32.vlgmr.msra.gmra.mrb[4].mxu1 %v465_v8  ;;  %v2365_v6 = vpack.c.bf16 %v900_v63, %v896_v62  ;;  %v899_v8 = vld [vmem:[#allocation8 + $0xd70] sm:$0xff]  ;;  %v934_v63 = vld [vmem:[#allocation8 + $0xe88] sm:$0xff] }
 0x1e2   :  { %2092 = vmatpush1.bf16.msra.mxu0 %v2091_v61  ;;  %2348 = vmatpush1.bf16.msra.mxu1 %v2347_v9  ;;  %v902_v61 = vld [vmem:[#allocation8 + $0xd88] sm:$0xff]  ;;  %v931_v62 = vld [vmem:[#allocation8 + $0xe70] sm:$0xff] }
 0x1e3   :  { %2094 = vmatprep.subr.bf16.mxu0 %v2093_v13  ;;  %2350 = vmatprep.subr.bf16.mxu1 %v2349_v14  ;;  %v906_v9 = vld [vmem:[#allocation8 + $0xda8] sm:$0xff]  ;;  %v2111_v13 = vpack.c.bf16 %v897_v3, %v893_v2  ;;  %v2367_v14 = vpack.c.bf16 %v899_v8, %v895_v7  ;;  %v940_v2 = vld [vmem:[#allocation8 + $0xeb8] sm:$0xff]  ;;  %v937_v7 = vld [vmem:[#allocation8 + $0xea0] sm:$0xff] }
 0x1e4   :  { %1280 = vmatprep.mubr.f32.mxu0 %v468_v22  ;;  %1564 = vmatprep.mubr.f32.mxu1 %v468_v22  ;;  %v2113_v17 = vpack.c.bf16 %v906_v9, %v902_v61  ;;  %v910_v22 = vld [vmem:[#allocation8 + $0xdc8] sm:$0xff]  ;;  %v935_v9 = vld [vmem:[#allocation8 + $0xe90] sm:$0xff] }
 0x1e6   :  { %2096 = vmatpush1.bf16.msra.mxu0 %v2095_v18  ;;  %2352 = vmatpush1.bf16.msra.mxu1 %v2351_v23  ;;  %v914_v18 = vld [vmem:[#allocation8 + $0xde8] sm:$0xff]  ;;  %v912_v23 = vld [vmem:[#allocation8 + $0xdd8] sm:$0xff] }
 0x1e7   :  { %2098 = vmatprep.subr.bf16.mxu0 %v2097_v26  ;;  %2354 = vmatprep.subr.bf16.mxu1 %v2353_v27  ;;  %v2371_v26 = vpack.c.bf16 %v907_v21, %v903_v20  ;;  %v909_v27 = vld [vmem:[#allocation8 + $0xdc0] sm:$0xff]  ;;  %v2117_v29 = vpack.c.bf16 %v914_v18, %v910_v22  ;;  %v2373_v30 = vpack.c.bf16 %v916_v24, %v912_v23  ;;  %v943_v18 = vld [vmem:[#allocation8 + $0xed0] sm:$0xff]  ;;  %v950_v24 = vld [vmem:[#allocation8 + $0xf08] sm:$0xff] }
 0x1e8   :  { %v2119_v41 = vpack.c.bf16 %v913_v28, %v909_v27  ;;  %v945_v20 = vld [vmem:[#allocation8 + $0xee0] sm:$0xff]  ;;  %v947_v23 = vld [vmem:[#allocation8 + $0xef0] sm:$0xff]  ;;  %v956_v27 = vld [vmem:[#allocation8 + $0xf38] sm:$0xff] }
 0x1ea   :  { %2100 = vmatpush1.bf16.msra.mxu0 %v2099_v53  ;;  %2356 = vmatpush1.bf16.msra.mxu1 %v2355_v38  ;;  %v922_v53 = vld [vmem:[#allocation8 + $0xe28] sm:$0xff]  ;;  %v920_v38 = vld [vmem:[#allocation8 + $0xe18] sm:$0xff] }
 0x1eb   :  { %2102 = vmatprep.subr.bf16.mxu0 %v2101_v42  ;;  %2358 = vmatprep.subr.bf16.mxu1 %v2357_v43  ;;  %v2375_v42 = vpack.c.bf16 %v915_v35, %v911_v31  ;;  %v917_v43 = vld [vmem:[#allocation8 + $0xe00] sm:$0xff]  ;;  %v2121_v45 = vpack.c.bf16 %v922_v53, %v918_v32  ;;  %v2377_v46 = vpack.c.bf16 %v924_v39, %v920_v38  ;;  %v951_v53 = vld [vmem:[#allocation8 + $0xf10] sm:$0xff]  ;;  %v958_v39 = vld [vmem:[#allocation8 + $0xf48] sm:$0xff] }
 0x1ec   :  { %v2123_v54 = vpack.c.bf16 %v921_v44, %v917_v43  ;;  %v953_v31 = vld [vmem:[#allocation8 + $0xf20] sm:$0xff]  ;;  %v955_v38 = vld [vmem:[#allocation8 + $0xf30] sm:$0xff]  ;;  %v964_v43 = vld [vmem:[#allocation8 + $0xf78] sm:$0xff] }
 0x1ee   :  { %2104 = vmatpush1.bf16.msra.mxu0 %v2103_v4  ;;  %2360 = vmatpush1.bf16.msra.mxu1 %v2359_v51  ;;  %v930_v4 = vld [vmem:[#allocation8 + $0xe68] sm:$0xff]  ;;  %v928_v51 = vld [vmem:[#allocation8 + $0xe58] sm:$0xff] }
 0x1ef   :  { %2106 = vmatprep.subr.bf16.mxu0 %v2105_v55  ;;  %2362 = vmatprep.subr.bf16.mxu1 %v2361_v56  ;;  %v2379_v55 = vpack.c.bf16 %v923_v48, %v919_v47  ;;  %v925_v56 = vld [vmem:[#allocation8 + $0xe40] sm:$0xff]  ;;  %v2125_v58 = vpack.c.bf16 %v930_v4, %v926_v49  ;;  %v2381_v59 = vpack.c.bf16 %v932_v52, %v928_v51  ;;  %v959_v4 = vld [vmem:[#allocation8 + $0xf50] sm:$0xff]  ;;  %v966_v52 = vld [vmem:[#allocation8 + $0xf88] sm:$0xff] }
 0x1f0   :  { %v2127_v3 = vpack.c.bf16 %v929_v57, %v925_v56  ;;  %v961_v47 = vld [vmem:[#allocation8 + $0xf60] sm:$0xff]  ;;  %v963_v51 = vld [vmem:[#allocation8 + $0xf70] sm:$0xff]  ;;  %v972_v56 = vld [vmem:[#allocation8 + $0xfb8] sm:$0xff] }
 0x1f2   :  { %2108 = vmatpush1.bf16.msra.mxu0 %v2107_v0  ;;  %2364 = vmatpush1.bf16.msra.mxu1 %v2363_v1  ;;  %v938_v0 = vld [vmem:[#allocation8 + $0xea8] sm:$0xff]  ;;  %v936_v1 = vld [vmem:[#allocation8 + $0xe98] sm:$0xff] }
 0x1f3   :  { %2110 = vmatprep.subr.bf16.mxu0 %v2109_v5  ;;  %2366 = vmatprep.subr.bf16.mxu1 %v2365_v6  ;;  %v2383_v5 = vpack.c.bf16 %v931_v62, %v927_v60  ;;  %v933_v6 = vld [vmem:[#allocation8 + $0xe80] sm:$0xff]  ;;  %v2129_v8 = vpack.c.bf16 %v938_v0, %v934_v63  ;;  %v2385_v61 = vpack.c.bf16 %v940_v2, %v936_v1  ;;  %v159_v62 = vsub.s32 6, %v2836_v33  ;;  %v967_v1 = vld [vmem:[#allocation8 + $0xf90] sm:$0xff] }
 0x1f4   :  { %v2131_v16 = vpack.c.bf16 %v937_v7, %v933_v6  ;;  %v969_v60 = vld [vmem:[#allocation8 + $0xfa0] sm:$0xff]  ;;  %v971_v2 = vld [vmem:[#allocation8 + $0xfb0] sm:$0xff]  ;;  %v976_v6 = vld [vmem:[#allocation8 + $0xfd8] sm:$0xff] }
 0x1f5   :  { %v980_v7 = vld [vmem:[#allocation8 + $0xff8] sm:$0xff]  ;;  %v1810_v33 = vld [vmem:[#allocation13] ss:$0 sm:$0xff] }
 0x1f6   :  { %2112 = vmatpush1.bf16.msra.mxu0 %v2111_v13  ;;  %2368 = vmatpush1.bf16.msra.mxu1 %v2367_v14  ;;  %v946_v13 = vld [vmem:[#allocation8 + $0xee8] sm:$0xff]  ;;  %v944_v14 = vld [vmem:[#allocation8 + $0xed8] sm:$0xff] }
 0x1f7   :  { %2114 = vmatprep.subr.bf16.mxu0 %v2113_v17  ;;  %2370 = vmatprep.subr.bf16.mxu1 %v2369_v19  ;;  %v2387_v17 = vpack.c.bf16 %v939_v11, %v935_v9  ;;  %v941_v19 = vld [vmem:[#allocation8 + $0xec0] sm:$0xff]  ;;  %v2133_v21 = vpack.c.bf16 %v946_v13, %v942_v12  ;;  %v2389_v22 = vpack.c.bf16 %v948_v15, %v944_v14  ;;  %v975_v15 = vld [vmem:[#allocation8 + $0xfd0] sm:$0xff] }
 0x1f8   :  { %v2135_v28 = vpack.c.bf16 %v945_v20, %v941_v19  ;;  %v973_v9 = vld [vmem:[#allocation8 + $0xfc0] sm:$0xff]  ;;  %v160_v12 = vrot.slane %v2872_v40, %v159_v62  ;;  %v2405_v14 = vpack.c.bf16 %v980_v7, %v976_v6  ;;  %v1592_v19 = vld [vmem:[#allocation11 + $0x88] sm:$0xff]  ;;  %v1613_v6 = vld [vmem:[#allocation11 + $0x130] sm:$0xff] }
 0x1f9   :  { %v977_v11 = vld [vmem:[#allocation8 + $0xfe0] sm:$0xff] }
 0x1fa   :  { %2116 = vmatpush1.bf16.msra.mxu0 %v2115_v25  ;;  %2372 = vmatpush1.bf16.msra.mxu1 %v2371_v26  ;;  %v954_v25 = vld [vmem:[#allocation8 + $0xf28] sm:$0xff]  ;;  %v952_v26 = vld [vmem:[#allocation8 + $0xf18] sm:$0xff] }
 0x1fb   :  { %2118 = vmatprep.subr.bf16.mxu0 %v2117_v29  ;;  %2374 = vmatprep.subr.bf16.mxu1 %v2373_v30  ;;  %v2391_v29 = vpack.c.bf16 %v947_v23, %v943_v18  ;;  %v949_v30 = vld [vmem:[#allocation8 + $0xf00] sm:$0xff]  ;;  %v2137_v35 = vpack.c.bf16 %v954_v25, %v950_v24  ;;  %v2393_v32 = vpack.c.bf16 %v956_v27, %v952_v26  ;;  %v1576_v24 = vld [vmem:[#allocation11 + $0x8] sm:$0xff] }
 0x1fc   :  { %v2139_v44 = vpack.c.bf16 %v953_v31, %v949_v30  ;;  %v1623_v20 = vld [vmem:[#allocation11 + $0x180] sm:$0xff]  ;;  %v457_v25 = vadd.f32 %v2858_v10, %v160_v12  ;;  %v1594_v30 = vld [vmem:[#allocation11 + $0x98] sm:$0xff]  ;;  %v1625_v31 = vld [vmem:[#allocation11 + $0x190] sm:$0xff] }
 0x1fd   :  { %v1575_v23 = vld [vmem:[#allocation11] sm:$0xff]  ;;  %v1630_v62 = vld [vmem:[#allocation11 + $0x1b8] sm:$0xff] }
 0x1fe   :  { %2120 = vmatpush1.bf16.msra.mxu0 %v2119_v41  ;;  %2376 = vmatpush1.bf16.msra.mxu1 %v2375_v42  ;;  %v962_v41 = vld [vmem:[#allocation8 + $0xf68] sm:$0xff]  ;;  %v960_v42 = vld [vmem:[#allocation8 + $0xf58] sm:$0xff] }
 0x1ff   :  { %2122 = vmatprep.subr.bf16.mxu0 %v2121_v45  ;;  %2378 = vmatprep.subr.bf16.mxu1 %v2377_v46  ;;  %v2395_v45 = vpack.c.bf16 %v955_v38, %v951_v53  ;;  %v957_v46 = vld [vmem:[#allocation8 + $0xf40] sm:$0xff]  ;;  %v2141_v48 = vpack.c.bf16 %v962_v41, %v958_v39  ;;  %v2397_v49 = vpack.c.bf16 %v964_v43, %v960_v42  ;;  %v1577_v38 = vld [vmem:[#allocation11 + $0x10] sm:$0xff]  ;;  %v467_v41 = vmax.f32 %v457_v25, 0.0 }
 0x200   :  { %v2143_v57 = vpack.c.bf16 %v961_v47, %v957_v46  ;;  %v1607_v27 = vld [vmem:[#allocation11 + $0x100] sm:$0xff]  ;;  %v1578_v39 = vld [vmem:[#allocation11 + $0x18] sm:$0xff]  ;;  %v1609_v43 = vld [vmem:[#allocation11 + $0x110] sm:$0xff] }
 0x201   :  { %v1596_v46 = vld [vmem:[#allocation11 + $0xa8] sm:$0xff]  ;;  %v1627_v47 = vld [vmem:[#allocation11 + $0x1a0] sm:$0xff]  ;;  %v1614_v7 = vld [vmem:[#allocation11 + $0x138] sm:$0xff] }
 0x202   :  { %2124 = vmatpush1.bf16.msra.mxu0 %v2123_v54  ;;  %2380 = vmatpush1.bf16.msra.mxu1 %v2379_v55  ;;  %v970_v54 = vld [vmem:[#allocation8 + $0xfa8] sm:$0xff]  ;;  %v968_v55 = vld [vmem:[#allocation8 + $0xf98] sm:$0xff] }
 0x203   :  { %2126 = vmatprep.subr.bf16.mxu0 %v2125_v58  ;;  %2382 = vmatprep.subr.bf16.mxu1 %v2381_v59  ;;  %v2399_v58 = vpack.c.bf16 %v963_v51, %v959_v4  ;;  %v965_v59 = vld [vmem:[#allocation8 + $0xf80] sm:$0xff]  ;;  %v2145_v63 = vpack.c.bf16 %v970_v54, %v966_v52  ;;  %v2401_v0 = vpack.c.bf16 %v972_v56, %v968_v55  ;;  %v1580_v52 = vld [vmem:[#allocation11 + $0x28] sm:$0xff] }
 0x204   :  { %v1579_v51 = vld [vmem:[#allocation11 + $0x20] sm:$0xff] }
 0x205   :  { %v1611_v56 = vld [vmem:[#allocation11 + $0x120] sm:$0xff] }
 0x206   :  { %2128 = vmatpush1.bf16.msra.mxu0 %v2127_v3  ;;  %2384 = vmatpush1.bf16.msra.mxu1 %v2383_v5  ;;  %v974_v3 = vld [vmem:[#allocation8 + $0xfc8] sm:$0xff] }
 0x207   :  { %2130 = vmatprep.subr.bf16.mxu0 %v2129_v8  ;;  %2386 = vmatprep.subr.bf16.mxu1 %v2385_v61  ;;  %v978_v5 = vld [vmem:[#allocation8 + $0xfe8] sm:$0xff]  ;;  %v2147_v8 = vpack.c.bf16 %v969_v60, %v965_v59  ;;  %v2403_v61 = vpack.c.bf16 %v971_v2, %v967_v1  ;;  %v1598_v59 = vld [vmem:[#allocation11 + $0xb8] sm:$0xff]  ;;  %v1629_v60 = vld [vmem:[#allocation11 + $0x1b0] sm:$0xff] }
 0x208   :  { %v2149_v13 = vpack.c.bf16 %v978_v5, %v974_v3  ;;  %v1581_v1 = vld [vmem:[#allocation11 + $0x30] sm:$0xff]  ;;  %v1582_v2 = vld [vmem:[#allocation11 + $0x38] sm:$0xff]  ;;  %v2453_v5 = vpack.c.bf16 %v1630_v62, %v1629_v60 }
 0x209   :  { %v2423_v12 = vpack.c.bf16 %v1582_v2, %v1581_v1  ;;  %v981_v62 = vld [vmem:[#allocation10] sm:$0xf] }
 0x20a   :  { %2132 = vmatpush1.bf16.msra.mxu0 %v2131_v16  ;;  %2388 = vmatpush1.bf16.msra.mxu1 %v2387_v17  ;;  %v979_v16 = vld [vmem:[#allocation8 + $0xff0] sm:$0xff]  ;;  %v1591_v17 = vld [vmem:[#allocation11 + $0x80] sm:$0xff]  ;;  %v990_v1 = vrot.slane %v981_v62, %v139_v36  ;;  %v998_v2 = vrot.slane %v981_v62, %v147_v37 }
 0x20b   :  { %2134 = vmatprep.subr.bf16.mxu0 %v2133_v21  ;;  %2390 = vmatprep.subr.bf16.mxu1 %v2389_v22  ;;  %v1624_v21 = vld [vmem:[#allocation11 + $0x188] sm:$0xff]  ;;  %v2151_v22 = vpack.c.bf16 %v977_v11, %v973_v9  ;;  %v2407_v18 = vpack.c.bf16 %v979_v16, %v975_v15  ;;  %v2409_v40 = vpack.c.bf16 %v1592_v19, %v1591_v17  ;;  %v1631_v9 = vld [vmem:[#allocation11 + $0x1c0] sm:$0xff] }
 0x20c   :  { %v2441_v26 = vpack.c.bf16 %v1624_v21, %v1623_v20  ;;  %v1632_v11 = vld [vmem:[#allocation11 + $0x1c8] sm:$0xff]  ;;  %v1615_v19 = vld [vmem:[#allocation11 + $0x140] sm:$0xff]  ;;  %v1601_v21 = vld [vmem:[#allocation11 + $0xd0] sm:$0xff] }
 0x20d   :  { %v1584_v15 = vld [vmem:[#allocation11 + $0x48] sm:$0xff]  ;;  %v2457_v17 = vpack.c.bf16 %v1632_v11, %v1631_v9 }
 0x20e   :  { %2136 = vmatpush1.bf16.msra.mxu0 %v2135_v28  ;;  %2392 = vmatpush1.bf16.msra.mxu1 %v2391_v29  ;;  %v1608_v28 = vld [vmem:[#allocation11 + $0x108] sm:$0xff]  ;;  %v1593_v29 = vld [vmem:[#allocation11 + $0x90] sm:$0xff] }
 0x20f   :  { %2138 = vmatprep.subr.bf16.mxu0 %v2137_v35  ;;  %2394 = vmatprep.subr.bf16.mxu1 %v2393_v32  ;;  %v1626_v35 = vld [vmem:[#allocation11 + $0x198] sm:$0xff]  ;;  %v2411_v32 = vpack.c.bf16 %v1576_v24, %v1575_v23  ;;  %v2443_v53 = vpack.c.bf16 %v1608_v28, %v1607_v27  ;;  %v2413_v10 = vpack.c.bf16 %v1594_v30, %v1593_v29  ;;  %v1616_v20 = vld [vmem:[#allocation11 + $0x148] sm:$0xff]  ;;  %v1617_v29 = vld [vmem:[#allocation11 + $0x150] sm:$0xff] }
 0x210   :  { %v2445_v42 = vpack.c.bf16 %v1626_v35, %v1625_v31  ;;  %v1634_v23 = vld [vmem:[#allocation11 + $0x1d8] sm:$0xff]  ;;  %v2459_v25 = vpack.c.bf16 %v1616_v20, %v1615_v19  ;;  %v1603_v31 = vld [vmem:[#allocation11 + $0xe0] sm:$0xff]  ;;  %v1604_v35 = vld [vmem:[#allocation11 + $0xe8] sm:$0xff] }
 0x211   :  { %v1618_v30 = vld [vmem:[#allocation11 + $0x158] sm:$0xff] }
 0x212   :  { %2140 = vmatpush1.bf16.msra.mxu0 %v2139_v44  ;;  %2396 = vmatpush1.bf16.msra.mxu1 %v2395_v45  ;;  %v1610_v44 = vld [vmem:[#allocation11 + $0x118] sm:$0xff]  ;;  %v1595_v45 = vld [vmem:[#allocation11 + $0xa0] sm:$0xff] }
 0x213   :  { %2142 = vmatprep.subr.bf16.mxu0 %v2141_v48  ;;  %2398 = vmatprep.subr.bf16.mxu1 %v2397_v49  ;;  %v1628_v48 = vld [vmem:[#allocation11 + $0x1a8] sm:$0xff]  ;;  %v2415_v49 = vpack.c.bf16 %v1578_v39, %v1577_v38  ;;  %v2447_v4 = vpack.c.bf16 %v1610_v44, %v1609_v43  ;;  %v2417_v54 = vpack.c.bf16 %v1596_v46, %v1595_v45  ;;  %v1619_v44 = vld [vmem:[#allocation11 + $0x160] sm:$0xff] }
 0x214   :  { %v2449_v55 = vpack.c.bf16 %v1628_v48, %v1627_v47  ;;  %v2463_v39 = vpack.c.bf16 %v1618_v30, %v1617_v29  ;;  %v1588_v43 = vld [vmem:[#allocation11 + $0x68] sm:$0xff]  ;;  %v1605_v48 = vld [vmem:[#allocation11 + $0xf0] sm:$0xff] }
 0x215   :  { %v1620_v46 = vld [vmem:[#allocation11 + $0x168] sm:$0xff] }
 0x216   :  { %2144 = vmatpush1.bf16.msra.mxu0 %v2143_v57  ;;  %2400 = vmatpush1.bf16.msra.mxu1 %v2399_v58  ;;  %v1612_v57 = vld [vmem:[#allocation11 + $0x128] sm:$0xff]  ;;  %v1597_v58 = vld [vmem:[#allocation11 + $0xb0] sm:$0xff]  ;;  %v2467_v47 = vpack.c.bf16 %v1620_v46, %v1619_v44 }
 0x217   :  { %2146 = vmatprep.subr.bf16.mxu0 %v2145_v63  ;;  %2402 = vmatprep.subr.bf16.mxu1 %v2401_v0  ;;  %v2419_v63 = vpack.c.bf16 %v1580_v52, %v1579_v51  ;;  %v2451_v0 = vpack.c.bf16 %v1612_v57, %v1611_v56  ;;  %v2421_v3 = vpack.c.bf16 %v1598_v59, %v1597_v58  ;;  %v1638_v52 = vld [vmem:[#allocation11 + $0x1f8] sm:$0xff]  ;;  %v1621_v58 = vld [vmem:[#allocation11 + $0x170] sm:$0xff] }
 0x218   :  { %v1622_v59 = vld [vmem:[#allocation11 + $0x178] sm:$0xff] }
 0x219   :  { %v2471_v60 = vpack.c.bf16 %v1622_v59, %v1621_v58 }
 0x21a   :  { %2148 = vmatpush1.bf16.msra.mxu0 %v2147_v8  ;;  %2404 = vmatpush1.bf16.msra.mxu1 %v2403_v61  ;;  %v1599_v8 = vld [vmem:[#allocation11 + $0xc0] sm:$0xff]  ;;  %v1600_v61 = vld [vmem:[#allocation11 + $0xc8] sm:$0xff] }
 0x21b   :  { %2150 = vmatprep.subr.bf16.mxu0 %v2149_v13  ;;  %2406 = vmatprep.subr.bf16.mxu1 %v2405_v14  ;;  %v2455_v13 = vpack.c.bf16 %v1614_v7, %v1613_v6  ;;  %v1583_v14 = vld [vmem:[#allocation11 + $0x40] sm:$0xff]  ;;  %v2425_v16 = vpack.c.bf16 %v1600_v61, %v1599_v8 }
 0x21c   :  { %v2427_v24 = vpack.c.bf16 %v1584_v15, %v1583_v14 }
 0x21e   :  { %2152 = vmatpush1.bf16.msra.mxu0 %v2151_v22  ;;  %2408 = vmatpush1.bf16.msra.mxu1 %v2407_v18  ;;  %v1602_v22 = vld [vmem:[#allocation11 + $0xd8] sm:$0xff]  ;;  %v1633_v18 = vld [vmem:[#allocation11 + $0x1d0] sm:$0xff] }
 0x21f   :  { %2410 = vmatprep.subr.bf16.mxu0 %v2409_v40  ;;  %2442 = vmatprep.subr.bf16.mxu1 %v2441_v26  ;;  %v1585_v40 = vld [vmem:[#allocation11 + $0x50] sm:$0xff]  ;;  %v1586_v26 = vld [vmem:[#allocation11 + $0x58] sm:$0xff]  ;;  %v2429_v27 = vpack.c.bf16 %v1602_v22, %v1601_v21  ;;  %v2461_v28 = vpack.c.bf16 %v1634_v23, %v1633_v18 }
 0x220   :  { %v2431_v38 = vpack.c.bf16 %v1586_v26, %v1585_v40 }
 0x221   :  { %1281 = vmatmul.mubr.f32.vlgmr.msra.gmra.mrb[4].mxu0 %v467_v41  ;;  %1565 = vmatmul.mubr.f32.vlgmr.msra.gmra.mrb[4].mxu1 %v467_v41  ;;  %v2433_v41 = vpack.c.bf16 %v1604_v35, %v1603_v31 }
 0x222   :  { %2412 = vmatpush3.bf16.msra.mxu0 %v2411_v32  ;;  %2444 = vmatpush3.bf16.msra.mxu1 %v2443_v53  ;;  %v1635_v32 = vld [vmem:[#allocation11 + $0x1e0] sm:$0xff]  ;;  %v1636_v53 = vld [vmem:[#allocation11 + $0x1e8] sm:$0xff] }
 0x223   :  { %2414 = vmatprep.subr.bf16.mxu0 %v2413_v10  ;;  %2446 = vmatprep.subr.bf16.mxu1 %v2445_v42  ;;  %v2465_v10 = vpack.c.bf16 %v1636_v53, %v1635_v32  ;;  %v1587_v42 = vld [vmem:[#allocation11 + $0x60] sm:$0xff] }
 0x224   :  { %v2435_v45 = vpack.c.bf16 %v1588_v43, %v1587_v42 }
 0x226   :  { %2416 = vmatpush3.bf16.msra.mxu0 %v2415_v49  ;;  %2448 = vmatpush3.bf16.msra.mxu1 %v2447_v4  ;;  %v1606_v49 = vld [vmem:[#allocation11 + $0xf8] sm:$0xff]  ;;  %v1637_v4 = vld [vmem:[#allocation11 + $0x1f0] sm:$0xff] }
 0x227   :  { %2418 = vmatprep.subr.bf16.mxu0 %v2417_v54  ;;  %2450 = vmatprep.subr.bf16.mxu1 %v2449_v55  ;;  %v2437_v51 = vpack.c.bf16 %v1606_v49, %v1605_v48  ;;  %v1589_v54 = vld [vmem:[#allocation11 + $0x70] sm:$0xff]  ;;  %v1590_v55 = vld [vmem:[#allocation11 + $0x78] sm:$0xff]  ;;  %v2469_v56 = vpack.c.bf16 %v1638_v52, %v1637_v4 }
 0x228   :  { %v2439_v57 = vpack.c.bf16 %v1590_v55, %v1589_v54 }
 0x22a   :  { %2420 = vmatpush3.bf16.msra.mxu0 %v2419_v63  ;;  %2452 = vmatpush3.bf16.msra.mxu1 %v2451_v0  ;;  %v986_v63 = vrot.slane %v981_v62, %v135_v34  ;;  %v994_v0 = vrot.slane %v981_v62, %v143_v50 }
 0x22b   :  { %2422 = vmatprep.subr.bf16.mxu0 %v2421_v3  ;;  %2454 = vmatprep.subr.bf16.mxu1 %v2453_v5 }
 0x22e   :  { %2424 = vmatpush3.bf16.msra.mxu0 %v2423_v12  ;;  %2456 = vmatpush3.bf16.msra.mxu1 %v2455_v13 }
 0x22f   :  { %2426 = vmatprep.subr.bf16.mxu0 %v2425_v16  ;;  %2458 = vmatprep.subr.bf16.mxu1 %v2457_v17 }
 0x232   :  { %2428 = vmatpush3.bf16.msra.mxu0 %v2427_v24  ;;  %2460 = vmatpush3.bf16.msra.mxu1 %v2459_v25 }
 0x233   :  { %2430 = vmatprep.subr.bf16.mxu0 %v2429_v27  ;;  %2462 = vmatprep.subr.bf16.mxu1 %v2461_v28 }
 0x236   :  { %2432 = vmatpush3.bf16.msra.mxu0 %v2431_v38  ;;  %2464 = vmatpush3.bf16.msra.mxu1 %v2463_v39 }
 0x237   :  { %2434 = vmatprep.subr.bf16.mxu0 %v2433_v41  ;;  %2466 = vmatprep.subr.bf16.mxu1 %v2465_v10 }
 0x23a   :  { %2436 = vmatpush3.bf16.msra.mxu0 %v2435_v45  ;;  %2468 = vmatpush3.bf16.msra.mxu1 %v2467_v47 }
 0x23b   :  { %2438 = vmatprep.subr.bf16.mxu0 %v2437_v51  ;;  %2470 = vmatprep.subr.bf16.mxu1 %v2469_v56 }
 0x23e   :  { %2440 = vmatpush3.bf16.msra.mxu0 %v2439_v57  ;;  %2472 = vmatpush3.bf16.msra.mxu1 %v2471_v60 }
 0x2f4   :  { %v1282_v3 = vpop.f32.mrb[4].mxu0  ;;  %v1566_v5 = vpop.f32.mrb[4].mxu1 }
 0x2f5   :  { %v2473_v6 = vadd.f32 %v1282_v3, %v986_v63  ;;  %v2475_v7 = vadd.f32 %v1566_v5, %v994_v0  ;;  %v1284_v8 = vpop.f32.mrb[5].mxu0  ;;  %v1568_v61 = vpop.f32.mrb[5].mxu1 }
 0x2f6   :  { %v2474_v9 = vadd.f32 %v1284_v8, %v990_v1  ;;  %v2476_v11 = vadd.f32 %v1568_v61, %v998_v2 }
 0x2f7   :  { %v1571_v34 = vmax.f32 %v2473_v6, 0.0  ;;  %v1573_v14 = vmax.f32 %v2475_v7, 0.0 }
 0x2f8   :  { %v1572_v12 = vmax.f32 %v2474_v9, 0.0  ;;  %v1574_v13 = vmax.f32 %v2476_v11, 0.0 }
 0x2fa   :  { %1710 = vmatprep.mubr.f32.mxu0 %v1572_v12  ;;  %1780 = vmatprep.mubr.f32.mxu1 %v1574_v13 }
 0x2fb   :  { %1711 = vmatmul.mubr.f32.vlgmr.msra.gmra.mrb[6].mxu0 %v1571_v34  ;;  %1781 = vmatmul.mubr.f32.vlgmr.msra.gmra.mrb[6].mxu1 %v1573_v14 }
 0x3ce   :  { %v1843_v36 = vpop.f32.mrb[6].mxu0  ;;  %v1878_v50 = vpop.f32.mrb[6].mxu1 }
 0x3cf   :  { %v1844_v37 = vpop.f32.mrb[7].mxu0  ;;  %v1879_v15 = vpop.f32.mrb[7].mxu1 }
 0x3d0   :  { %v1845_v16 = vadd.f32 %v1844_v37, %v1843_v36  ;;  %v1880_v17 = vadd.f32 %v1879_v15, %v1878_v50 }
 0x3d2   :  { %v1713_v19 = vadd.f32 %v1845_v16, %v1810_v33 }
 0x3d4   :  { %v1783_v20 = vadd.f32 %v1880_v17, %v1713_v19 }
 0x3d6   :  { %2504 = vtanh.f32 %v1783_v20 }
 0x3e0   :  { %v2505_v21 = vpop.eup %2504 }
 0x3e1   :  { %1787 = vst [vmem:[#allocation14] sm:$0xff] %v2505_v21 }
 0x3e2   :  { %2672 = shalt.err (!%p2669_p4)
}
 0x3e3   :  { %s2673_s15 = scalar_lea.hbm %s2908_s7, 128 }
 0x3e4   :  { %p2674_p5 = scmp.ne.s32.totalorder %s2908_s7, %s2673_s15  ;;  %p2677_p6 = scmp.lt.u32.totalorder %s2673_s15, %s2908_s7 }
 0x3e6   :  { %p2679_p7 = pnand %p2677_p6, %p2674_p5 }
 0x3e8   :  { %2682 = shalt.err (!%p2679_p7)
}
 0x3e9   :  { %1797 = dma.vmem_to_hbm [thread:$0]  %s1795_s13, 128, %s2908_s7, [#allocation4]  }
 0x3ea   :  { %2691 = dma.done.wait [#allocation4], 128  }
 0x3eb   :  { %2692 = vsyncadd [#allocation4], 4294967168 }
 0x3ec   :  { %1801 = vsyncpa [#allocation3], 1 }
 0x3ed   :  { %1802 = vsyncpa [#allocation6], 1 }
 0x3ee   :  { %1803 = vsyncpa [#allocation9], 1 }
 0x3ef   :  { %1804 = vsyncpa [#allocation12], 1 }
 0x3f0   :  { %1805 = vsyncpa [#allocation4], 1 }

</bundles_post_ra>
